<compile_context>
chip_gen: v5e
topology: v5e:2x2
jax: 0.10.0
libtpu: 0.0.40
codegen_flags: <defaults>
</compile_context>

<pallas_src>
import jax
import jax.numpy as jnp
from jax import lax
from jax.experimental import pallas as pl
from jax.experimental.pallas import tpu as pltpu


def mlp_kernel(x_ref, w1t_ref, b1_ref, w2_ref, b2_ref, w3_ref, b3_ref, o_ref):
    """One batch tile of the 3-layer sigmoid MLP.

    x_ref   : (TB, 800)  input tile (tiled over the batch grid axis)
    w1t_ref : (15, 800)  layer-1 weights stored transposed (lane-dense rows)
    b1_ref  : (1, 15)
    w2_ref  : (15, 15)
    b2_ref  : (1, 15)
    w3_ref  : (15, 4)
    b3_ref  : (1, 4)
    o_ref   : (TB, 4)
    """
    x = x_ref[...]

    # Layer 1: contract x's 800-axis against W1^T's 800-axis -> (TB, 15).
    z = lax.dot_general(
        x, w1t_ref[...],
        dimension_numbers=(((1,), (1,)), ((), ())),
        preferred_element_type=jnp.float32,
    ) + b1_ref[...]
    z2 = jax.nn.sigmoid(z)  # logistic -> EUP slot

    # Layers 2/3 are tiny; MXU is mostly padding here but the kernel is
    # DMA/launch bound so the simple dot formulation is fine.
    z3 = jnp.dot(z2, w2_ref[...], preferred_element_type=jnp.float32) + b2_ref[...]
    z4 = jax.nn.sigmoid(z3)

    z5 = jnp.dot(z4, w3_ref[...], preferred_element_type=jnp.float32) + b3_ref[...]
    o_ref[...] = jax.nn.sigmoid(z5).astype(o_ref.dtype)


def neural_network_forward(x, w1, b1, w2, b2, w3, b3, *, tb=128):
    """Forward pass matching Neural_Network.forward. x: (B, 800) float32."""
    B, in_dim = x.shape
    out_dim = w3.shape[1]

    # Store W1 transposed: (15, 800) -> contiguous DMA rows, small VMEM tile.
    w1t = w1.T

    # Pad the batch so the grid divides evenly; slice the result back.
    n_tiles = pl.cdiv(B, tb)
    bp = n_tiles * tb
    if bp != B:
        x = jnp.pad(x, ((0, bp - B), (0, 0)))

    # Weights/biases: full-array blocks, constant index_map -> VMEM-resident.
    resident = lambda arr: pl.BlockSpec(arr.shape, lambda i: (0, 0))

    out = pl.pallas_call(
        mlp_kernel,
        out_shape=jax.ShapeDtypeStruct((bp, out_dim), jnp.float32),
        grid=(n_tiles,),
        in_specs=[
            pl.BlockSpec((tb, in_dim), lambda i: (i, 0)),  # x tiled over batch
            resident(w1t),
            resident(b1),
            resident(w2),
            resident(b2),
            resident(w3),
            resident(b3),
        ],
        out_specs=pl.BlockSpec((tb, out_dim), lambda i: (i, 0)),
        compiler_params=pltpu.CompilerParams(
            dimension_semantics=("parallel",),   # shard batch tiles across TCs (v7x)
            vmem_limit_bytes=32 * 1024 * 1024,   # ~1 MB live; safe on v7x 64 MiB VMEM
        ),
    )(x, w1t, b1, w2, b2, w3, b3)

    return out[:B]


def reference_forward(x, w1, b1, w2, b2, w3, b3):
    z2 = jax.nn.sigmoid(x @ w1 + b1)
    z4 = jax.nn.sigmoid(z2 @ w2 + b2)
    return jax.nn.sigmoid(z4 @ w3 + b3)


if __name__ == "__main__":
    input_size, hidden, hidden2, output_size = 800, 15, 15, 4
    # Batch enough rows through one call to amortize launch/DMA overhead
    # (the module's (1, 800) input is just the B=1 special case).
    batch = 256

    key = jax.random.PRNGKey(0)
    kx, k1, k2, k3, kb1, kb2, kb3 = jax.random.split(key, 7)

    # Mirrors sampleztensor = torch.ones(1, 800), slightly perturbed per row.
    x = jnp.ones((batch, input_size), dtype=jnp.float32)
    x = x * (1.0 + 0.01 * jax.random.normal(kx, (batch, input_size), dtype=jnp.float32))

    # Deterministic randn-style parameters (synthetic, no checkpoint load).
    W1 = jax.random.normal(k1, (input_size, hidden), dtype=jnp.float32)
    W2 = jax.random.normal(k2, (hidden, hidden2), dtype=jnp.float32)
    W3 = jax.random.normal(k3, (hidden2, output_size), dtype=jnp.float32)
    B1 = jax.random.normal(kb1, (1, hidden), dtype=jnp.float32)
    B2 = jax.random.normal(kb2, (1, hidden2), dtype=jnp.float32)
    B3 = jax.random.normal(kb3, (1, output_size), dtype=jnp.float32)

    out = neural_network_forward(x, W1, B1, W2, B2, W3, B3)
    out = jax.block_until_ready(out)

    ref = reference_forward(x, W1, B1, W2, B2, W3, B3)
    assert out.shape == (batch, output_size)
    assert jnp.allclose(out, ref, atol=1e-5, rtol=1e-5), "Pallas output mismatch vs reference"

    print("KERNEL_OK")
</pallas_src>

<mosaic_0001>
module attributes {stable_mosaic.version = 11 : i64} {
  func.func @mlp_kernel(%arg0: i32, %arg1: memref<128x800xf32, #tpu.memory_space<vmem>>, %arg2: memref<15x800xf32, #tpu.memory_space<vmem>>, %arg3: memref<1x15xf32, #tpu.memory_space<vmem>>, %arg4: memref<15x15xf32, #tpu.memory_space<vmem>>, %arg5: memref<1x15xf32, #tpu.memory_space<vmem>>, %arg6: memref<15x4xf32, #tpu.memory_space<vmem>>, %arg7: memref<1x4xf32, #tpu.memory_space<vmem>>, %arg8: memref<128x4xf32, #tpu.memory_space<vmem>>) attributes {dimension_semantics = [#tpu.dimension_semantics<parallel>], iteration_bounds = array<i64: 2>, scalar_prefetch = 0 : i64, scratch_operands = 0 : i64, tpu.core_type = #tpu.core_type<tc>, window_params = [{transform_indices = @transform_0, window_bounds = array<i64: 128, 800>}, {pipeline_mode = #tpu.pipeline_mode<synchronous>, transform_indices = @transform_1, window_bounds = array<i64: 15, 800>}, {pipeline_mode = #tpu.pipeline_mode<synchronous>, transform_indices = @transform_2, window_bounds = array<i64: 1, 15>}, {pipeline_mode = #tpu.pipeline_mode<synchronous>, transform_indices = @transform_3, window_bounds = array<i64: 15, 15>}, {pipeline_mode = #tpu.pipeline_mode<synchronous>, transform_indices = @transform_4, window_bounds = array<i64: 1, 15>}, {pipeline_mode = #tpu.pipeline_mode<synchronous>, transform_indices = @transform_5, window_bounds = array<i64: 15, 4>}, {pipeline_mode = #tpu.pipeline_mode<synchronous>, transform_indices = @transform_6, window_bounds = array<i64: 1, 4>}, {transform_indices = @transform_7, window_bounds = array<i64: 128, 4>}]} {
    %c0 = arith.constant 0 : index
    %c0_0 = arith.constant 0 : index
    %0 = vector.load %arg1[%c0, %c0_0] : memref<128x800xf32, #tpu.memory_space<vmem>>, vector<128x800xf32>
    %c0_1 = arith.constant 0 : index
    %c0_2 = arith.constant 0 : index
    %1 = vector.load %arg2[%c0_1, %c0_2] : memref<15x800xf32, #tpu.memory_space<vmem>>, vector<15x800xf32>
    %cst = arith.constant dense<0.000000e+00> : vector<128x15xf32>
    %2 = tpu.matmul %0, %1, %cst {dimension_numbers = #tpu.dot_dimension_numbers<[1], [1], [0], [0], [0, 0, 1, 0], [], []>} : vector<128x800xf32>, vector<15x800xf32>, vector<128x15xf32> -> vector<128x15xf32>
    %c0_3 = arith.constant 0 : index
    %c0_4 = arith.constant 0 : index
    %3 = vector.load %arg3[%c0_3, %c0_4] : memref<1x15xf32, #tpu.memory_space<vmem>>, vector<1x15xf32>
    %4 = vector.broadcast %3 : vector<1x15xf32> to vector<128x15xf32>
    %5 = arith.addf %2, %4 : vector<128x15xf32>
    %6 = arith.negf %5 : vector<128x15xf32>
    %7 = math.exp %6 : vector<128x15xf32>
    %cst_5 = arith.constant 1.000000e+00 : f32
    %8 = vector.broadcast %cst_5 : f32 to vector<128x15xf32>
    %9 = arith.addf %8, %7 : vector<128x15xf32>
    %10 = arith.divf %8, %9 : vector<128x15xf32>
    %c0_6 = arith.constant 0 : index
    %c0_7 = arith.constant 0 : index
    %11 = vector.load %arg4[%c0_6, %c0_7] : memref<15x15xf32, #tpu.memory_space<vmem>>, vector<15x15xf32>
    %cst_8 = arith.constant dense<0.000000e+00> : vector<128x15xf32>
    %12 = tpu.matmul %10, %11, %cst_8 {dimension_numbers = #tpu.dot_dimension_numbers<[1], [0], [0], [1], [0, 0, 1, 1], [], []>} : vector<128x15xf32>, vector<15x15xf32>, vector<128x15xf32> -> vector<128x15xf32>
    %c0_9 = arith.constant 0 : index
    %c0_10 = arith.constant 0 : index
    %13 = vector.load %arg5[%c0_9, %c0_10] : memref<1x15xf32, #tpu.memory_space<vmem>>, vector<1x15xf32>
    %14 = vector.broadcast %13 : vector<1x15xf32> to vector<128x15xf32>
    %15 = arith.addf %12, %14 : vector<128x15xf32>
    %16 = arith.negf %15 : vector<128x15xf32>
    %17 = math.exp %16 : vector<128x15xf32>
    %cst_11 = arith.constant 1.000000e+00 : f32
    %18 = vector.broadcast %cst_11 : f32 to vector<128x15xf32>
    %19 = arith.addf %18, %17 : vector<128x15xf32>
    %20 = arith.divf %18, %19 : vector<128x15xf32>
    %c0_12 = arith.constant 0 : index
    %c0_13 = arith.constant 0 : index
    %21 = vector.load %arg6[%c0_12, %c0_13] : memref<15x4xf32, #tpu.memory_space<vmem>>, vector<15x4xf32>
    %cst_14 = arith.constant dense<0.000000e+00> : vector<128x4xf32>
    %22 = tpu.matmul %20, %21, %cst_14 {dimension_numbers = #tpu.dot_dimension_numbers<[1], [0], [0], [1], [0, 0, 1, 1], [], []>} : vector<128x15xf32>, vector<15x4xf32>, vector<128x4xf32> -> vector<128x4xf32>
    %c0_15 = arith.constant 0 : index
    %c0_16 = arith.constant 0 : index
    %23 = vector.load %arg7[%c0_15, %c0_16] : memref<1x4xf32, #tpu.memory_space<vmem>>, vector<1x4xf32>
    %24 = vector.broadcast %23 : vector<1x4xf32> to vector<128x4xf32>
    %25 = arith.addf %22, %24 : vector<128x4xf32>
    %26 = arith.negf %25 : vector<128x4xf32>
    %27 = math.exp %26 : vector<128x4xf32>
    %cst_17 = arith.constant 1.000000e+00 : f32
    %28 = vector.broadcast %cst_17 : f32 to vector<128x4xf32>
    %29 = arith.addf %28, %27 : vector<128x4xf32>
    %30 = arith.divf %28, %29 : vector<128x4xf32>
    %c0_18 = arith.constant 0 : index
    %c0_19 = arith.constant 0 : index
    %31 = vector.load %arg8[%c0_18, %c0_19] : memref<128x4xf32, #tpu.memory_space<vmem>>, vector<128x4xf32>
    tpu.vector_store %arg8[%c0_18, %c0_19], %30 {strides = array<i32>} : memref<128x4xf32, #tpu.memory_space<vmem>>, vector<128x4xf32>,
    return
  }
  func.func @transform_0(%arg0: i32) -> (i32, i32) {
    %c0_i32 = arith.constant 0 : i32
    %c0_i32_0 = arith.constant 0 : i32
    return %arg0, %c0_i32 : i32, i32
  }
  func.func @transform_1(%arg0: i32) -> (i32, i32) {
    %c0_i32 = arith.constant 0 : i32
    %c0_i32_0 = arith.constant 0 : i32
    %c0_i32_1 = arith.constant 0 : i32
    return %c0_i32, %c0_i32_0 : i32, i32
  }
  func.func @transform_2(%arg0: i32) -> (i32, i32) {
    %c0_i32 = arith.constant 0 : i32
    %c0_i32_0 = arith.constant 0 : i32
    %c0_i32_1 = arith.constant 0 : i32
    return %c0_i32, %c0_i32_0 : i32, i32
  }
  func.func @transform_3(%arg0: i32) -> (i32, i32) {
    %c0_i32 = arith.constant 0 : i32
    %c0_i32_0 = arith.constant 0 : i32
    %c0_i32_1 = arith.constant 0 : i32
    return %c0_i32, %c0_i32_0 : i32, i32
  }
  func.func @transform_4(%arg0: i32) -> (i32, i32) {
    %c0_i32 = arith.constant 0 : i32
    %c0_i32_0 = arith.constant 0 : i32
    %c0_i32_1 = arith.constant 0 : i32
    return %c0_i32, %c0_i32_0 : i32, i32
  }
  func.func @transform_5(%arg0: i32) -> (i32, i32) {
    %c0_i32 = arith.constant 0 : i32
    %c0_i32_0 = arith.constant 0 : i32
    %c0_i32_1 = arith.constant 0 : i32
    return %c0_i32, %c0_i32_0 : i32, i32
  }
  func.func @transform_6(%arg0: i32) -> (i32, i32) {
    %c0_i32 = arith.constant 0 : i32
    %c0_i32_0 = arith.constant 0 : i32
    %c0_i32_1 = arith.constant 0 : i32
    return %c0_i32, %c0_i32_0 : i32, i32
  }
  func.func @transform_7(%arg0: i32) -> (i32, i32) {
    %c0_i32 = arith.constant 0 : i32
    %c0_i32_0 = arith.constant 0 : i32
    return %arg0, %c0_i32 : i32, i32
  }
}

</mosaic_0001>

<bundles_post_ra>
// kernel: tpu_custom_call.1
= control target key start
LH: loop header
LB: loop body
LE: loop exit
PB: predicated region body
PF: predicated region fallthrough
CT: control target
= control target key end

     0   :  { %s2525_s24 = smov 0   ;;  %s3037_s0 = inlined_call_operand.vmem [shape: f32[256,800], index: 0, kind: input, shape index: {}]   ;;  %s3038_s1 = inlined_call_operand.vmem [shape: f32[15,800], index: 1, kind: input, shape index: {}]   ;;  %s3039_s2 = inlined_call_operand.vmem [shape: f32[1,15], index: 2, kind: input, shape index: {}]   ;;  %s3040_s3 = inlined_call_operand.vmem [shape: f32[15,15], index: 3, kind: input, shape index: {}]   ;;  %s3041_s4 = inlined_call_operand.vmem [shape: f32[1,15], index: 4, kind: input, shape index: {}]   ;;  %s3042_s5 = inlined_call_operand.vmem [shape: f32[15,4], index: 5, kind: input, shape index: {}]   ;;  %s3043_s6 = inlined_call_operand.vmem [shape: f32[1,4], index: 6, kind: input, shape index: {}]   ;;  %s3044_s7 = inlined_call_operand.vmem [shape: f32[256,4], index: 7, kind: output, shape index: {}]  }
   0x1 LB: > { %s2156_s25 = sadd.s32 4294967295, %s2483_s24   ;;  %p2160_p0 = scmp.ge.s32.totalorder %s2483_s24, 1  ;;  %s2483_s24 = sphi %s2525_s24, %s17_s24  }
   0x2   : > { %p239_p1 = scmp.lt.s32.totalorder %s2483_s24, 3 }
   0x4   : > { %p240_p2 = pnand %p2160_p0, %p239_p1 }
   0x5   : > { %s2161_s28 = sshll.u32 (!%p240_p2), %s2156_s25, 4 }
   0x6   : > { %243 = sbr.rel (%p240_p2) target bundleno = 780 (0x30c), region = 48  ;;  %p273_p3 = scmp.lt.s32.totalorder (!%p240_p2), %s2161_s28, 31 }
   0xb   : > { %v404_v0 = vld [vmem:[%s3038_s1 + $0x38] sm:$0x7f]  ;;  %v397_v1 = vld [vmem:[%s3038_s1] sm:$0xff]  ;;  %v406_v2 = vld [vmem:[%s3038_s1 + $0x48] sm:$0x7f]  ;;  %s3046_s28 = smov (!%p273_p3, %s2161_s28), 31 }
   0xc   : > { %2267 = vmatpush.xpose.msra.mxu1 %v404_v0  ;;  %2268 = vmatpush.xpose.msra.mxu2 %v404_v0  ;;  %v405_v3 = vld [vmem:[%s3038_s1 + $0x40] sm:$0x7f]  ;;  %s2273_s12 = smul.u32 56, %s3046_s28  ;;  %v407_v4 = vld [vmem:[%s3038_s1 + $0x50] sm:$0x7f]  ;;  %v398_v6 = vld [vmem:[%s3038_s1 + $0x8] sm:$0xff] }
   0xd   : > { %2269 = vmatpush.xpose.msra.mxu3 %v404_v0  ;;  %484 = vmatpush.xpose.msra.mxu0 %v404_v0  ;;  %v399_v5 = vld [vmem:[%s3038_s1 + $0x10] sm:$0xff]  ;;  %v400_v11 = vld [vmem:[%s3038_s1 + $0x18] sm:$0xff]  ;;  %vm415_vm0 = vcmask 261120   ;;  %v410_v12 = vld [vmem:[%s3038_s1 + $0x68] sm:$0x7f]  ;;  %vm1284_vm1 = vcmask 1046528  }
   0xe   : > { %s2554_s17 = scalar_lea.vmem %s3037_s0, %s2273_s12  ;;  %v408_v15 = vld [vmem:[%s3038_s1 + $0x58] sm:$0x7f]  ;;  %v409_v18 = vld [vmem:[%s3038_s1 + $0x60] sm:$0x7f]  ;;  %v403_v48 = vld [vmem:[%s3038_s1 + $0x30] sm:$0xff]  ;;  %vm1235_vm5 = vcmask 121856  }
   0xf   : > { %v313_v7 = vld [vmem:[%s2554_s17 + $0xe0] sm:$0xff]  ;;  %v320_v13 = vld [vmem:[%s2554_s17 + $0x118] sm:$0xff]  ;;  %v327_v20 = vld [vmem:[%s2554_s17 + $0x150] sm:$0xff]  ;;  %s2164_s8 = sshll.u32 %s3046_s28, 3 }
  0x10   : > { %2270 = vmatpush.xpose.msra.mxu1 %v397_v1  ;;  %2271 = vmatpush.xpose.msra.mxu2 %v397_v1  ;;  %v341_v8 = vld [vmem:[%s2554_s17 + $0x1c0] sm:$0xff]  ;;  %v348_v14 = vld [vmem:[%s2554_s17 + $0x1f8] sm:$0xff]  ;;  %v355_v21 = vld [vmem:[%s2554_s17 + $0x230] sm:$0xff]  ;;  %s2988_s11 = scalar_lea.vmem %s3044_s7, %s2164_s8 }
  0x11   : > { %2272 = vmatpush.xpose.msra.mxu3 %v397_v1  ;;  %485 = vmatpush.xpose.msra.mxu0 %v397_v1  ;;  %v369_v9 = vld [vmem:[%s2554_s17 + $0x2a0] sm:$0xff]  ;;  %v376_v16 = vld [vmem:[%s2554_s17 + $0x2d8] sm:$0xff]  ;;  %v383_v22 = vld [vmem:[%s2554_s17 + $0x310] sm:$0xff] }
  0x12   : > { %v285_v10 = vld [vmem:[%s2554_s17] sm:$0xff]  ;;  %v292_v17 = vld [vmem:[%s2554_s17 + $0x38] sm:$0xff]  ;;  %v299_v23 = vld [vmem:[%s2554_s17 + $0x70] sm:$0xff] }
  0x13   : > { %498 = vmatmul.f32.vlgmr.msra.gmra.mxu1 %v313_v7  ;;  %510 = vmatmul.f32.vlgmr.msra.gmra.mxu2 %v341_v8  ;;  %v401_v19 = vld [vmem:[%s3038_s1 + $0x20] sm:$0xff]  ;;  %v334_v24 = vld [vmem:[%s2554_s17 + $0x188] sm:$0xff]  ;;  %v287_v29 = vld [vmem:[%s2554_s17 + $0x10] sm:$0xff] }
  0x14   : > { %614 = vmatpush.xpose.msrb.mxu2 %v406_v2  ;;  %549 = vmatpush.xpose.msrb.mxu1 %v405_v3  ;;  %v362_v25 = vld [vmem:[%s2554_s17 + $0x268] sm:$0xff]  ;;  %v288_v30 = vld [vmem:[%s2554_s17 + $0x18] sm:$0xff]  ;;  %v289_v31 = vld [vmem:[%s2554_s17 + $0x20] sm:$0xff] }
  0x15   : > { %679 = vmatpush.xpose.msrb.mxu3 %v407_v4  ;;  %486 = vmatmul.f32.vlgmr.msra.gmra.mxu0 %v285_v10  ;;  %v390_v26 = vld [vmem:[%s2554_s17 + $0x348] sm:$0xff]  ;;  %v293_v32 = vld [vmem:[%s2554_s17 + $0x40] sm:$0xff]  ;;  %v295_v34 = vld [vmem:[%s2554_s17 + $0x50] sm:$0xff] }
  0x16   : > { %522 = vmatmul.f32.vlgmr.msra.gmra.mxu3 %v369_v9  ;;  %744 = vmatpush.xpose.msrb.mxu0 %v408_v15  ;;  %v306_v27 = vld [vmem:[%s2554_s17 + $0xa8] sm:$0xff]  ;;  %v296_v35 = vld [vmem:[%s2554_s17 + $0x58] sm:$0xff]  ;;  %v301_v37 = vld [vmem:[%s2554_s17 + $0x80] sm:$0xff] }
  0x17   : > { %v286_v28 = vld [vmem:[%s2554_s17 + $0x8] sm:$0xff]  ;;  %v300_v36 = vld [vmem:[%s2554_s17 + $0x78] sm:$0xff]  ;;  %v303_v39 = vld [vmem:[%s2554_s17 + $0x90] sm:$0xff] }
  0x18   : > { %615 = vmatpush.xpose.msrb.mxu2 %v399_v5  ;;  %550 = vmatpush.xpose.msrb.mxu1 %v398_v6  ;;  %v294_v33 = vld [vmem:[%s2554_s17 + $0x48] sm:$0xff]  ;;  %v307_v40 = vld [vmem:[%s2554_s17 + $0xb0] sm:$0xff]  ;;  %v308_v41 = vld [vmem:[%s2554_s17 + $0xb8] sm:$0xff] }
  0x19   : > { %680 = vmatpush.xpose.msrb.mxu3 %v400_v11  ;;  %v302_v38 = vld [vmem:[%s2554_s17 + $0x88] sm:$0xff]  ;;  %v309_v42 = vld [vmem:[%s2554_s17 + $0xc0] sm:$0xff]  ;;  %v315_v45 = vld [vmem:[%s2554_s17 + $0xf0] sm:$0xff] }
  0x1a   : > { %745 = vmatpush.xpose.msrb.mxu0 %v401_v19  ;;  %v310_v43 = vld [vmem:[%s2554_s17 + $0xc8] sm:$0xff]  ;;  %v316_v46 = vld [vmem:[%s2554_s17 + $0xf8] sm:$0xff]  ;;  %v317_v47 = vld [vmem:[%s2554_s17 + $0x100] sm:$0xff] }
  0x1b   : > { %501 = vmatmul.f32.gmra.mxu1 %v320_v13  ;;  %513 = vmatmul.f32.gmra.mxu2 %v348_v14  ;;  %v314_v44 = vld [vmem:[%s2554_s17 + $0xe8] sm:$0xff]  ;;  %v321_v50 = vld [vmem:[%s2554_s17 + $0x120] sm:$0xff]  ;;  %v323_v52 = vld [vmem:[%s2554_s17 + $0x130] sm:$0xff] }
  0x1c   : > { %2165 = vmatpush.xpose.msk.msra.mxu2 %vm415_vm0, %v410_v12  ;;  %809 = vmatpush.xpose.msra.mxu1 %v409_v18  ;;  %v402_v49 = vld [vmem:[%s3038_s1 + $0x28] sm:$0xff]  ;;  %v324_v53 = vld [vmem:[%s2554_s17 + $0x138] sm:$0xff]  ;;  %v329_v55 = vld [vmem:[%s2554_s17 + $0x160] sm:$0xff] }
  0x1d   : > { %489 = vmatmul.f32.gmra.mxu0 %v292_v17  ;;  %v322_v51 = vld [vmem:[%s2554_s17 + $0x128] sm:$0xff]  ;;  %v328_v54 = vld [vmem:[%s2554_s17 + $0x158] sm:$0xff]  ;;  %v331_v57 = vld [vmem:[%s2554_s17 + $0x170] sm:$0xff] }
  0x1e   : > { %525 = vmatmul.f32.gmra.mxu3 %v376_v16  ;;  %v330_v56 = vld [vmem:[%s2554_s17 + $0x168] sm:$0xff]  ;;  %v335_v58 = vld [vmem:[%s2554_s17 + $0x190] sm:$0xff]  ;;  %v336_v59 = vld [vmem:[%s2554_s17 + $0x198] sm:$0xff] }
  0x1f   : > { %v337_v60 = vld [vmem:[%s2554_s17 + $0x1a0] sm:$0xff]  ;;  %v338_v61 = vld [vmem:[%s2554_s17 + $0x1a8] sm:$0xff]  ;;  %v343_v63 = vld [vmem:[%s2554_s17 + $0x1d0] sm:$0xff] }
  0x20   : > { %2166 = vmatpush.xpose.msk.msra.mxu2 %vm415_vm0, %v403_v48  ;;  %810 = vmatpush.xpose.msra.mxu1 %v402_v49  ;;  %v342_v62 = vld [vmem:[%s2554_s17 + $0x1c8] sm:$0xff]  ;;  %v344_v0 = vld [vmem:[%s2554_s17 + $0x1d8] sm:$0xff]  ;;  %v345_v1 = vld [vmem:[%s2554_s17 + $0x1e0] sm:$0xff] }
  0x21   : > { %v349_v2 = vld [vmem:[%s2554_s17 + $0x200] sm:$0xff]  ;;  %v350_v3 = vld [vmem:[%s2554_s17 + $0x208] sm:$0xff]  ;;  %v351_v4 = vld [vmem:[%s2554_s17 + $0x210] sm:$0xff] }
  0x22   : > { %v352_v5 = vld [vmem:[%s2554_s17 + $0x218] sm:$0xff]  ;;  %v357_v7 = vld [vmem:[%s2554_s17 + $0x240] sm:$0xff]  ;;  %v358_v8 = vld [vmem:[%s2554_s17 + $0x248] sm:$0xff] }
  0x23   : > { %504 = vmatmul.f32.gmra.mxu1 %v327_v20  ;;  %516 = vmatmul.f32.gmra.mxu2 %v355_v21  ;;  %v356_v6 = vld [vmem:[%s2554_s17 + $0x238] sm:$0xff]  ;;  %v359_v9 = vld [vmem:[%s2554_s17 + $0x250] sm:$0xff]  ;;  %v365_v12 = vld [vmem:[%s2554_s17 + $0x280] sm:$0xff] }
  0x24   : > { %v363_v10 = vld [vmem:[%s2554_s17 + $0x270] sm:$0xff]  ;;  %v364_v11 = vld [vmem:[%s2554_s17 + $0x278] sm:$0xff]  ;;  %v366_v13 = vld [vmem:[%s2554_s17 + $0x288] sm:$0xff] }
  0x25   : > { %492 = vmatmul.f32.gmra.mxu0 %v299_v23  ;;  %v370_v15 = vld [vmem:[%s2554_s17 + $0x2a8] sm:$0xff]  ;;  %v371_v16 = vld [vmem:[%s2554_s17 + $0x2b0] sm:$0xff]  ;;  %v372_v17 = vld [vmem:[%s2554_s17 + $0x2b8] sm:$0xff] }
  0x26   : > { %528 = vmatmul.f32.gmra.mxu3 %v383_v22  ;;  %v373_v18 = vld [vmem:[%s2554_s17 + $0x2c0] sm:$0xff] }
  0x27   : > { %v2658_v19 = vld [vmem:[%s3039_s2] ss:$0 sm:$0xff] }
  0x28   : > { %v377_v23 = vld [vmem:[%s2554_s17 + $0x2e0] sm:$0xff] }
  0x29   : > { %v297_v49 = vld [vmem:[%s2554_s17 + $0x60] sm:$0xff] }
  0x2b   : > { %507 = vmatmul.f32.gmra.mxu1 %v334_v24  ;;  %519 = vmatmul.f32.gmra.mxu2 %v362_v25  ;;  %v378_v24 = vld [vmem:[%s2554_s17 + $0x2e8] sm:$0xff]  ;;  %v379_v25 = vld [vmem:[%s2554_s17 + $0x2f0] sm:$0xff] }
  0x2d   : > { %495 = vmatmul.f32.gmra.mxu0 %v306_v27 }
  0x2e   : > { %531 = vmatmul.f32.gmra.mxu3 %v390_v26  ;;  %v380_v26 = vld [vmem:[%s2554_s17 + $0x2f8] sm:$0xff] }
  0x33   : > { %551 = vmatmul.f32.vlgmr.msrb.gmra.mxu1 %v286_v28  ;;  %616 = vmatmul.f32.vlgmr.msrb.gmra.mxu2 %v287_v29 }
  0x35   : > { %746 = vmatmul.f32.vlgmr.msrb.gmra.mxu0 %v289_v31  ;;  %v385_v31 = vld [vmem:[%s2554_s17 + $0x320] sm:$0xff] }
  0x36   : > { %681 = vmatmul.f32.vlgmr.msrb.gmra.mxu3 %v288_v30  ;;  %v384_v30 = vld [vmem:[%s2554_s17 + $0x318] sm:$0xff] }
  0x3b   : > { %554 = vmatmul.f32.gmra.mxu1 %v293_v32  ;;  %619 = vmatmul.f32.gmra.mxu2 %v294_v33  ;;  %v386_v32 = vld [vmem:[%s2554_s17 + $0x328] sm:$0xff]  ;;  %v387_v33 = vld [vmem:[%s2554_s17 + $0x330] sm:$0xff] }
  0x3d   : > { %749 = vmatmul.f32.gmra.mxu0 %v296_v35 }
  0x3e   : > { %684 = vmatmul.f32.gmra.mxu3 %v295_v34 }
  0x43   : > { %557 = vmatmul.f32.gmra.mxu1 %v300_v36  ;;  %622 = vmatmul.f32.gmra.mxu2 %v301_v37  ;;  %v391_v37 = vld [vmem:[%s2554_s17 + $0x350] sm:$0xff] }
  0x45   : > { %752 = vmatmul.f32.gmra.mxu0 %v303_v39  ;;  %v393_v39 = vld [vmem:[%s2554_s17 + $0x360] sm:$0xff] }
  0x46   : > { %687 = vmatmul.f32.gmra.mxu3 %v302_v38  ;;  %v392_v38 = vld [vmem:[%s2554_s17 + $0x358] sm:$0xff] }
  0x4b   : > { %560 = vmatmul.f32.gmra.mxu1 %v307_v40  ;;  %625 = vmatmul.f32.gmra.mxu2 %v308_v41  ;;  %v394_v40 = vld [vmem:[%s2554_s17 + $0x368] sm:$0xff] }
  0x4d   : > { %755 = vmatmul.f32.gmra.mxu0 %v310_v43 }
  0x4e   : > { %690 = vmatmul.f32.gmra.mxu3 %v309_v42 }
  0x53   : > { %563 = vmatmul.f32.gmra.mxu1 %v314_v44  ;;  %628 = vmatmul.f32.gmra.mxu2 %v315_v45  ;;  %v290_v44 = vld [vmem:[%s2554_s17 + $0x28] sm:$0xff]  ;;  %v291_v45 = vld [vmem:[%s2554_s17 + $0x30] sm:$0xff] }
  0x55   : > { %758 = vmatmul.f32.gmra.mxu0 %v317_v47 }
  0x56   : > { %693 = vmatmul.f32.gmra.mxu3 %v316_v46  ;;  %v1230_v46 = vld [vmem:[%s3040_s3 + $0x8] sm:$0x7f] }
  0x57   : > { %2199 = vmatpush.msk.msra.mxu3 %vm1284_vm1, %v1230_v46 }
  0x5b   : > { %566 = vmatmul.f32.gmra.mxu1 %v321_v50  ;;  %631 = vmatmul.f32.gmra.mxu2 %v322_v51  ;;  %v298_v50 = vld [vmem:[%s2554_s17 + $0x68] sm:$0xff] }
  0x5d   : > { %761 = vmatmul.f32.gmra.mxu0 %v324_v53  ;;  %v304_v53 = vld [vmem:[%s2554_s17 + $0x98] sm:$0xff] }
  0x5e   : > { %696 = vmatmul.f32.gmra.mxu3 %v323_v52 }
  0x63   : > { %569 = vmatmul.f32.gmra.mxu1 %v328_v54  ;;  %634 = vmatmul.f32.gmra.mxu2 %v329_v55  ;;  %v305_v54 = vld [vmem:[%s2554_s17 + $0xa0] sm:$0xff] }
  0x65   : > { %764 = vmatmul.f32.gmra.mxu0 %v331_v57  ;;  %v311_v57 = vld [vmem:[%s2554_s17 + $0xd0] sm:$0xff] }
  0x66   : > { %699 = vmatmul.f32.gmra.mxu3 %v330_v56 }
  0x6b   : > { %572 = vmatmul.f32.gmra.mxu1 %v335_v58  ;;  %637 = vmatmul.f32.gmra.mxu2 %v336_v59  ;;  %v312_v58 = vld [vmem:[%s2554_s17 + $0xd8] sm:$0xff] }
  0x6d   : > { %767 = vmatmul.f32.gmra.mxu0 %v338_v61  ;;  %v318_v61 = vld [vmem:[%s2554_s17 + $0x108] sm:$0xff] }
  0x6e   : > { %702 = vmatmul.f32.gmra.mxu3 %v337_v60 }
  0x73   : > { %575 = vmatmul.f32.gmra.mxu1 %v342_v62  ;;  %640 = vmatmul.f32.gmra.mxu2 %v343_v63  ;;  %v319_v62 = vld [vmem:[%s2554_s17 + $0x110] sm:$0xff] }
  0x75   : > { %770 = vmatmul.f32.gmra.mxu0 %v345_v1  ;;  %v325_v1 = vld [vmem:[%s2554_s17 + $0x140] sm:$0xff] }
  0x76   : > { %705 = vmatmul.f32.gmra.mxu3 %v344_v0 }
  0x7b   : > { %578 = vmatmul.f32.gmra.mxu1 %v349_v2  ;;  %643 = vmatmul.f32.gmra.mxu2 %v350_v3  ;;  %v326_v2 = vld [vmem:[%s2554_s17 + $0x148] sm:$0xff] }
  0x7d   : > { %773 = vmatmul.f32.gmra.mxu0 %v352_v5  ;;  %v332_v5 = vld [vmem:[%s2554_s17 + $0x178] sm:$0xff] }
  0x7e   : > { %708 = vmatmul.f32.gmra.mxu3 %v351_v4 }
  0x83   : > { %581 = vmatmul.f32.gmra.mxu1 %v356_v6  ;;  %646 = vmatmul.f32.gmra.mxu2 %v357_v7  ;;  %v333_v6 = vld [vmem:[%s2554_s17 + $0x180] sm:$0xff] }
  0x85   : > { %776 = vmatmul.f32.gmra.mxu0 %v359_v9 }
  0x86   : > { %711 = vmatmul.f32.gmra.mxu3 %v358_v8 }
  0x8b   : > { %584 = vmatmul.f32.gmra.mxu1 %v363_v10  ;;  %649 = vmatmul.f32.gmra.mxu2 %v364_v11  ;;  %v339_v10 = vld [vmem:[%s2554_s17 + $0x1b0] sm:$0xff]  ;;  %v340_v11 = vld [vmem:[%s2554_s17 + $0x1b8] sm:$0xff] }
  0x8d   : > { %779 = vmatmul.f32.gmra.mxu0 %v366_v13 }
  0x8e   : > { %714 = vmatmul.f32.gmra.mxu3 %v365_v12 }
  0x90   : > { %v2649_v14 = vpop.f32.mrf.mxu1 }
  0x92   : > { %v2747_v12 = vpop.f32.mrf.mxu0 }
  0x93   : > { %587 = vmatmul.f32.gmra.mxu1 %v370_v15  ;;  %652 = vmatmul.f32.gmra.mxu2 %v371_v16 }
  0x95   : > { %782 = vmatmul.f32.gmra.mxu0 %v373_v18  ;;  %v347_v18 = vld [vmem:[%s2554_s17 + $0x1f0] sm:$0xff] }
  0x96   : > { %717 = vmatmul.f32.gmra.mxu3 %v372_v17  ;;  %v511_v20 = vpop.f32.mrf.mxu2  ;;  %v346_v17 = vld [vmem:[%s2554_s17 + $0x1e8] sm:$0xff] }
  0x97   : > { %v2661_v21 = vadd.f32 %v2658_v19, %v511_v20 }
  0x98   : > { %v2663_v22 = vpop.f32.mrf.mxu1 }
  0x99   : > { %v523_v7 = vpop.f32.mrf.mxu3 }
  0x9b   : > { %590 = vmatmul.f32.gmra.mxu1 %v377_v23  ;;  %655 = vmatmul.f32.gmra.mxu2 %v378_v24  ;;  %v2755_v23 = vpop.f32.mrf.mxu0  ;;  %v1229_v24 = vld [vmem:[%s3040_s3] sm:$0xff] }
  0x9c   : > { %1303 = vmatpush.msra.mxu3 %v1229_v24 }
  0x9d   : > { %785 = vmatmul.f32.gmra.mxu0 %v380_v26 }
  0x9e   : > { %720 = vmatmul.f32.gmra.mxu3 %v379_v25  ;;  %v514_v27 = vpop.f32.mrf.mxu2 }
  0x9f   : > { %v2670_v28 = vadd.f32 %v2658_v19, %v514_v27 }
  0xa0   : > { %v2672_v29 = vpop.f32.mrf.mxu1 }
  0xa1   : > { %v526_v15 = vpop.f32.mrf.mxu3 }
  0xa3   : > { %593 = vmatmul.f32.gmra.mxu1 %v384_v30  ;;  %658 = vmatmul.f32.gmra.mxu2 %v385_v31  ;;  %v353_v30 = vld [vmem:[%s2554_s17 + $0x220] sm:$0xff]  ;;  %v354_v31 = vld [vmem:[%s2554_s17 + $0x228] sm:$0xff] }
  0xa5   : > { %788 = vmatmul.f32.gmra.mxu0 %v387_v33  ;;  %v2767_v33 = vpop.f32.mrf.mxu0 }
  0xa6   : > { %723 = vmatmul.f32.gmra.mxu3 %v386_v32  ;;  %v517_v34 = vpop.f32.mrf.mxu2 }
  0xa7   : > { %v2679_v35 = vadd.f32 %v2658_v19, %v517_v34 }
  0xa8   : > { %v2681_v36 = vpop.f32.mrf.mxu1 }
  0xa9   : > { %v529_v32 = vpop.f32.mrf.mxu3 }
  0xab   : > { %596 = vmatmul.f32.gmra.mxu1 %v391_v37  ;;  %661 = vmatmul.f32.gmra.mxu2 %v392_v38 }
  0xad   : > { %791 = vmatmul.f32.gmra.mxu0 %v394_v40  ;;  %v361_v40 = vld [vmem:[%s2554_s17 + $0x260] sm:$0xff] }
  0xae   : > { %726 = vmatmul.f32.gmra.mxu3 %v393_v39  ;;  %v520_v41 = vpop.f32.mrf.mxu2  ;;  %v360_v39 = vld [vmem:[%s2554_s17 + $0x258] sm:$0xff] }
  0xaf   : > { %v2688_v42 = vadd.f32 %v2658_v19, %v520_v41 }
  0xb0   : > { %v2690_v43 = vpop.f32.mrf.mxu1 }
  0xb3   : > { %811 = vmatmul.f32.vlgmr.msra.gmra.mxu1 %v290_v44  ;;  %2167 = vmatmul.msk.f32.vlgmr.msra.gmra.mxu2 %vm415_vm0, %v291_v45  ;;  %v532_v44 = vpop.f32.mrf.mxu3  ;;  %v2775_v45 = vpop.f32.mrf.mxu0 }
  0xb6   : > { %v2699_v47 = vpop.f32.mrf.mxu2 }
  0xb8   : > { %v2701_v48 = vpop.f32.mrf.mxu1 }
  0xbb   : > { %814 = vmatmul.f32.gmra.mxu1 %v297_v49  ;;  %2168 = vmatmul.msk.f32.gmra.mxu2 %vm415_vm0, %v298_v50  ;;  %v367_v50 = vld [vmem:[%s2554_s17 + $0x290] sm:$0xff] }
  0xbe   : > { %v2706_v51 = vpop.f32.mrf.mxu2 }
  0xc0   : > { %v2708_v52 = vpop.f32.mrf.mxu1 }
  0xc3   : > { %817 = vmatmul.f32.gmra.mxu1 %v304_v53  ;;  %2169 = vmatmul.msk.f32.gmra.mxu2 %vm415_vm0, %v305_v54  ;;  %v368_v53 = vld [vmem:[%s2554_s17 + $0x298] sm:$0xff] }
  0xc6   : > { %v2713_v55 = vpop.f32.mrf.mxu2 }
  0xc8   : > { %v2715_v56 = vpop.f32.mrf.mxu1 }
  0xcb   : > { %820 = vmatmul.f32.gmra.mxu1 %v311_v57  ;;  %2170 = vmatmul.msk.f32.gmra.mxu2 %vm415_vm0, %v312_v58  ;;  %v682_v57 = vpop.f32.mrf.mxu3 }
  0xce   : > { %v2720_v59 = vpop.f32.mrf.mxu2 }
  0xd0   : > { %v2722_v60 = vpop.f32.mrf.mxu1 }
  0xd3   : > { %823 = vmatmul.f32.gmra.mxu1 %v318_v61  ;;  %2171 = vmatmul.msk.f32.gmra.mxu2 %vm415_vm0, %v319_v62 }
  0xd6   : > { %v2727_v63 = vpop.f32.mrf.mxu2 }
  0xd8   : > { %v2729_v0 = vpop.f32.mrf.mxu1 }
  0xdb   : > { %826 = vmatmul.f32.gmra.mxu1 %v325_v1  ;;  %2172 = vmatmul.msk.f32.gmra.mxu2 %vm415_vm0, %v326_v2  ;;  %v374_v1 = vld [vmem:[%s2554_s17 + $0x2c8] sm:$0xff]  ;;  %v375_v2 = vld [vmem:[%s2554_s17 + $0x2d0] sm:$0xff] }
  0xde   : > { %v2734_v3 = vpop.f32.mrf.mxu2 }
  0xe0   : > { %v2736_v4 = vpop.f32.mrf.mxu1 }
  0xe3   : > { %829 = vmatmul.f32.gmra.mxu1 %v332_v5  ;;  %2173 = vmatmul.msk.f32.gmra.mxu2 %vm415_vm0, %v333_v6  ;;  %v747_v5 = vpop.f32.mrf.mxu0 }
  0xe6   : > { %v2741_v8 = vpop.f32.mrf.mxu2 }
  0xe8   : > { %v2743_v9 = vpop.f32.mrf.mxu1 }
  0xeb   : > { %832 = vmatmul.f32.gmra.mxu1 %v339_v10  ;;  %2174 = vmatmul.msk.f32.gmra.mxu2 %vm415_vm0, %v340_v11  ;;  %v750_v24 = vpop.f32.mrf.mxu0 }
  0xee   : > { %v2750_v13 = vpop.f32.mrf.mxu2 }
  0xf0   : > { %v576_v16 = vpop.f32.mrf.mxu1 }
  0xf1   : > { %v577_v20 = vadd.f32 %v576_v16, %v2661_v21 }
  0xf3   : > { %835 = vmatmul.f32.gmra.mxu1 %v346_v17  ;;  %2175 = vmatmul.msk.f32.gmra.mxu2 %vm415_vm0, %v347_v18  ;;  %v381_v17 = vld [vmem:[%s2554_s17 + $0x300] sm:$0xff]  ;;  %v382_v18 = vld [vmem:[%s2554_s17 + $0x308] sm:$0xff] }
  0xf6   : > { %v641_v25 = vpop.f32.mrf.mxu2 }
  0xf7   : > { %v2761_v26 = vadd.f32 %v641_v25, %v577_v20  ;;  %v530_v25 = vadd.f32 %v2658_v19, %v529_v32 }
  0xf8   : > { %v579_v27 = vpop.f32.mrf.mxu1 }
  0xf9   : > { %v580_v21 = vadd.f32 %v579_v27, %v2670_v28 }
  0xfb   : > { %838 = vmatmul.f32.gmra.mxu1 %v353_v30  ;;  %2176 = vmatmul.msk.f32.gmra.mxu2 %vm415_vm0, %v354_v31  ;;  %v388_v31 = vld [vmem:[%s2554_s17 + $0x338] sm:$0xff] }
  0xfe   : > { %v644_v34 = vpop.f32.mrf.mxu2 }
  0xff   : > { %v2769_v37 = vadd.f32 %v644_v34, %v580_v21  ;;  %v389_v21 = vld [vmem:[%s2554_s17 + $0x340] sm:$0xff] }
 0x100   : > { %v582_v38 = vpop.f32.mrf.mxu1 }
 0x101   : > { %v583_v41 = vadd.f32 %v582_v38, %v2679_v35  ;;  %v524_v35 = vadd.f32 %v2658_v19, %v523_v7  ;;  %v685_v7 = vpop.f32.mrf.mxu3 }
 0x103   : > { %841 = vmatmul.f32.gmra.mxu1 %v360_v39  ;;  %2177 = vmatmul.msk.f32.gmra.mxu2 %vm415_vm0, %v361_v40  ;;  %v488_v39 = vadd.f32 %v2658_v19, %v2747_v12  ;;  %v533_v40 = vadd.f32 %v2658_v19, %v532_v44 }
 0x106   : > { %v647_v28 = vpop.f32.mrf.mxu2 }
 0x107   : > { %v2777_v46 = vadd.f32 %v647_v28, %v583_v41  ;;  %v753_v41 = vpop.f32.mrf.mxu0  ;;  %v553_v28 = vadd.f32 %v2690_v43, %v488_v39 }
 0x108   : > { %v585_v49 = vpop.f32.mrf.mxu1 }
 0x109   : > { %v586_v54 = vadd.f32 %v585_v49, %v2688_v42  ;;  %v527_v42 = vadd.f32 %v2658_v19, %v526_v15  ;;  %v688_v34 = vpop.f32.mrf.mxu3  ;;  %v618_v12 = vadd.f32 %v2699_v47, %v553_v28 }
 0x10b   : > { %844 = vmatmul.f32.gmra.mxu1 %v367_v50  ;;  %2178 = vmatmul.msk.f32.gmra.mxu2 %vm415_vm0, %v368_v53  ;;  %v395_v53 = vld [vmem:[%s2554_s17 + $0x370] sm:$0xff] }
 0x10e   : > { %v650_v58 = vpop.f32.mrf.mxu2 }
 0x10f   : > { %v2784_v61 = vadd.f32 %v650_v58, %v586_v54  ;;  %v396_v54 = vld [vmem:[%s2554_s17 + $0x378] sm:$0xff]  ;;  %v491_v58 = vadd.f32 %v2658_v19, %v2755_v23  ;;  %v756_v43 = vpop.f32.mrf.mxu0 }
 0x110   : > { %v588_v62 = vpop.f32.mrf.mxu1 }
 0x111   : > { %v589_v6 = vadd.f32 %v588_v62, %v524_v35  ;;  %v691_v62 = vpop.f32.mrf.mxu3 }
 0x113   : > { %847 = vmatmul.f32.gmra.mxu1 %v374_v1  ;;  %2179 = vmatmul.msk.f32.gmra.mxu2 %vm415_vm0, %v375_v2  ;;  %v556_v1 = vadd.f32 %v2701_v48, %v491_v58  ;;  %v683_v2 = vadd.f32 %v682_v57, %v618_v12 }
 0x115   : > { %v621_v23 = vadd.f32 %v2706_v51, %v556_v1 }
 0x116   : > { %v653_v10 = vpop.f32.mrf.mxu2 }
 0x117   : > { %v2790_v11 = vadd.f32 %v653_v10, %v589_v6  ;;  %v494_v10 = vadd.f32 %v2658_v19, %v2767_v33  ;;  %v759_v48 = vpop.f32.mrf.mxu0 }
 0x118   : > { %v591_v16 = vpop.f32.mrf.mxu1 }
 0x119   : > { %v592_v20 = vadd.f32 %v591_v16, %v527_v42  ;;  %v748_v16 = vadd.f32 %v747_v5, %v683_v2 }
 0x11b   : > { %850 = vmatmul.f32.gmra.mxu1 %v381_v17  ;;  %2180 = vmatmul.msk.f32.gmra.mxu2 %vm415_vm0, %v382_v18  ;;  %v694_v17 = vpop.f32.mrf.mxu3 }
 0x11e   : > { %v656_v27 = vpop.f32.mrf.mxu2 }
 0x11f   : > { %v2796_v30 = vadd.f32 %v656_v27, %v592_v20  ;;  %v559_v20 = vadd.f32 %v2708_v52, %v494_v10 }
 0x120   : > { %v594_v15 = vpop.f32.mrf.mxu1 }
 0x121   : > { %v595_v38 = vadd.f32 %v594_v15, %v530_v25  ;;  %v686_v25 = vadd.f32 %v685_v7, %v621_v23 }
 0x123   : > { %853 = vmatmul.f32.gmra.mxu1 %v388_v31  ;;  %2181 = vmatmul.msk.f32.gmra.mxu2 %vm415_vm0, %v389_v21  ;;  %v497_v31 = vadd.f32 %v2658_v19, %v2775_v45  ;;  %v751_v21 = vadd.f32 %v750_v24, %v686_v25  ;;  %v2827_v45 = vpop.f32.mrf.mxu0 }
 0x125   : > { %v562_v51 = vadd.f32 %v2715_v56, %v497_v31 }
 0x126   : > { %v659_v32 = vpop.f32.mrf.mxu2 }
 0x127   : > { %v2805_v49 = vadd.f32 %v659_v32, %v595_v38  ;;  %v624_v38 = vadd.f32 %v2713_v55, %v559_v20  ;;  %v500_v55 = vadd.f32 %v2658_v19, %v2649_v14 }
 0x128   : > { %v597_v50 = vpop.f32.mrf.mxu1 }
 0x129   : > { %v598_v35 = vadd.f32 %v597_v50, %v533_v40  ;;  %v689_v39 = vadd.f32 %v688_v34, %v624_v38  ;;  %v2824_v40 = vpop.f32.mrf.mxu3  ;;  %v565_v34 = vadd.f32 %v2722_v60, %v500_v55 }
 0x12b   : > { %856 = vmatmul.f32.gmra.mxu1 %v395_v53  ;;  %2182 = vmatmul.msk.f32.gmra.mxu2 %vm415_vm0, %v396_v54  ;;  %v754_v53 = vadd.f32 %v753_v41, %v689_v39  ;;  %v627_v54 = vadd.f32 %v2720_v59, %v562_v51  ;;  %v630_v1 = vadd.f32 %v2727_v63, %v565_v34  ;;  %v2838_v23 = vpop.f32.mrf.mxu0 }
 0x12d   : > { %v695_v14 = vadd.f32 %v694_v17, %v630_v1 }
 0x12e   : > { %v662_v44 = vpop.f32.mrf.mxu2 }
 0x12f   : > { %v2814_v6 = vadd.f32 %v662_v44, %v598_v35  ;;  %v692_v35 = vadd.f32 %v691_v62, %v627_v54  ;;  %v760_v31 = vadd.f32 %v759_v48, %v695_v14 }
 0x130   : > { %v812_v42 = vpop.f32.mrf.mxu1 }
 0x131   : > { %v813_v47 = vadd.f32 %v812_v42, %v748_v16  ;;  %v2833_v41 = vpop.f32.mrf.mxu3  ;;  %v757_v10 = vadd.f32 %v756_v43, %v692_v35 }
 0x136   : > { %v877_v18 = vpop.f32.mrf.mxu2 }
 0x137   : > { %v878_v27 = vadd.f32 %v877_v18, %v813_v47  ;;  %v503_v47 = vadd.f32 %v2658_v19, %v2663_v22 }
 0x138   : > { %v815_v15 = vpop.f32.mrf.mxu1 }
 0x139   : > { %v2183_v57 = vmul.f32 -1.442695, %v878_v27  ;;  %v816_v33 = vadd.f32 %v815_v15, %v751_v21  ;;  %v568_v43 = vadd.f32 %v2729_v0, %v503_v47  ;;  %v2846_v51 = vpop.f32.mrf.mxu3 }
 0x13b   : > { %2285 = vpow2.f32 %v2183_v57 }
 0x13e   : > { %v880_v5 = vpop.f32.mrf.mxu2 }
 0x13f   : > { %v881_v52 = vadd.f32 %v880_v5, %v816_v33  ;;  %v633_v33 = vadd.f32 %v2734_v3, %v568_v43  ;;  %v506_v3 = vadd.f32 %v2658_v19, %v2672_v29 }
 0x140   : > { %v818_v7 = vpop.f32.mrf.mxu1 }
 0x141   : > { %v2286_v32 = vpop.eup %2285  ;;  %v2184_v28 = vmul.f32 -1.442695, %v881_v52  ;;  %v819_v24 = vadd.f32 %v818_v7, %v754_v53  ;;  %v2855_v53 = vpop.f32.mrf.mxu0 }
 0x142   : > { %v973_v50 = vadd.f32 1.0, %v2286_v32  ;;  %v698_v32 = vadd.f32 %v2824_v40, %v633_v33  ;;  %v1658_v33 = vld [vmem:[%s3042_s5 + $0x8] sm:$0x7f] }
 0x143   : > { %2287 = vpow2.f32 %v2184_v28  ;;  %2232 = vmatpush.msk.msra.mxu0 %vm1284_vm1, %v1658_v33 }
 0x144   : > { %2289 = vrcp.f32 %v973_v50  ;;  %v1000_v18 = vand.u32 2147483648, %v973_v50  ;;  %v998_v27 = vand.u32 2147483647, %v973_v50  ;;  %vm994_vm3 = vweird.f32 %v973_v50 }
 0x145   : > { %v763_v40 = vadd.f32 %v2827_v45, %v698_v32 }
 0x146   : > { %v883_v56 = vpop.f32.mrf.mxu2  ;;  %v1001_v22 = vor.u32 1.1754944e-38, %v1000_v18  ;;  %vm999_vm6 = vcmp.eq.f32.partialorder %v998_v27, 8.507059e+37 }
 0x147   : > { %v884_v58 = vadd.f32 %v883_v56, %v819_v24  ;;  %v571_v56 = vadd.f32 %v2736_v4, %v506_v3 }
 0x148   : > { %v821_v12 = vpop.f32.mrf.mxu1 }
 0x149   : > { %v2288_v44 = vpop.eup %2287  ;;  %v2185_v59 = vmul.f32 -1.442695, %v884_v58  ;;  %v822_v62 = vadd.f32 %v821_v12, %v757_v10  ;;  %v2875_v43 = vpop.f32.mrf.mxu0 }
 0x14a   : > { %v2290_v2 = vpop.eup %2289  ;;  %v2835_v42 = vadd.f32 1.0, %v2288_v44  ;;  %v636_v44 = vadd.f32 %v2741_v8, %v571_v56  ;;  %v509_v8 = vadd.f32 %v2658_v19, %v2681_v36 }
 0x14b   : > { %v990_v16 = vmul.f32 %v2290_v2, %v973_v50  ;;  %2291 = vpow2.f32 %v2185_v59  ;;  %vm995_vm2 = vweird.f32 %v2290_v2 }
 0x14c   : > { %2293 = vrcp.f32 %v2835_v42  ;;  %vm996_vm4 = vmor %vm994_vm3, %vm995_vm2  ;;  %v1015_v50 = vand.u32 2147483648, %v2835_v42  ;;  %v1013_v24 = vand.u32 2147483647, %v2835_v42  ;;  %vm1009_vm8 = vweird.f32 %v2835_v42 }
 0x14d   : > { %v991_v60 = vsub.f32 1.0, %v990_v16  ;;  %v2866_v16 = vpop.f32.mrf.mxu3  ;;  %v701_v14 = vadd.f32 %v2833_v41, %v636_v44 }
 0x14e   : > { %v886_v63 = vpop.f32.mrf.mxu2  ;;  %v1016_v59 = vor.u32 1.1754944e-38, %v1015_v50  ;;  %vm1014_vm10 = vcmp.eq.f32.partialorder %v1013_v24, 8.507059e+37 }
 0x14f   : > { %v887_v20 = vadd.f32 %v886_v63, %v822_v62  ;;  %v992_v25 = vmul.f32 %v2290_v2, %v991_v60  ;;  %v766_v36 = vadd.f32 %v2838_v23, %v701_v14 }
 0x150   : > { %v824_v15 = vpop.f32.mrf.mxu1 }
 0x151   : > { %v2292_v57 = vpop.eup %2291  ;;  %v2186_v21 = vmul.f32 -1.442695, %v887_v20  ;;  %v993_v17 = vadd.f32 %v2290_v2, %v992_v25  ;;  %v825_v52 = vadd.f32 %v824_v15, %v760_v31  ;;  %v574_v20 = vadd.f32 %v2743_v9, %v509_v8  ;;  %v774_v56 = vpop.f32.mrf.mxu0 }
 0x152   : > { %v2294_v38 = vpop.eup %2293  ;;  %v2844_v5 = vadd.f32 1.0, %v2292_v57 }
 0x153   : > { %2295 = vpow2.f32 %v2186_v21  ;;  %v997_v39 = vsel %vm996_vm4, %v2290_v2, %v993_v17  ;;  %v1005_v0 = vmul.f32 %v2294_v38, %v2835_v42  ;;  %vm1010_vm7 = vweird.f32 %v2294_v38 }
 0x154   : > { %2297 = vrcp.f32 %v2844_v5  ;;  %v1002_v48 = vsel %vm999_vm6, %v1001_v22, %v997_v39  ;;  %vm1011_vm9 = vmor %vm1009_vm8, %vm1010_vm7  ;;  %v1030_v62 = vand.u32 2147483648, %v2844_v5  ;;  %v1028_v18 = vand.u32 2147483647, %v2844_v5 }
 0x155   : > { %2200 = vmatmul.msk.f32.vlgmr.msra.gmra.mxu3 %vm1235_vm5, %v1002_v48  ;;  %v1006_v7 = vsub.f32 1.0, %v1005_v0  ;;  %vm1024_vm12 = vweird.f32 %v2844_v5  ;;  %v639_v41 = vadd.f32 %v2750_v13, %v574_v20  ;;  %v709_v0 = vpop.f32.mrf.mxu3 }
 0x156   : > { %v889_v28 = vpop.f32.mrf.mxu2  ;;  %v1031_v21 = vor.u32 1.1754944e-38, %v1030_v62  ;;  %vm1029_vm14 = vcmp.eq.f32.partialorder %v1028_v18, 8.507059e+37 }
 0x157   : > { %v890_v54 = vadd.f32 %v889_v28, %v825_v52  ;;  %v1007_v55 = vmul.f32 %v2294_v38, %v1006_v7  ;;  %v704_v23 = vadd.f32 %v2846_v51, %v639_v41 }
 0x158   : > { %v827_v34 = vpop.f32.mrf.mxu1 }
 0x159   : > { %v2296_v35 = vpop.eup %2295  ;;  %v2187_v58 = vmul.f32 -1.442695, %v890_v54  ;;  %v1008_v12 = vadd.f32 %v2294_v38, %v1007_v55  ;;  %v828_v42 = vadd.f32 %v827_v34, %v763_v40  ;;  %v769_v55 = vadd.f32 %v2855_v53, %v704_v23  ;;  %v777_v18 = vpop.f32.mrf.mxu0 }
 0x15a   : > { %v2298_v29 = vpop.eup %2297  ;;  %v2862_v1 = vadd.f32 1.0, %v2296_v35  ;;  %v707_v40 = vadd.f32 %v2866_v16, %v2761_v26 }
 0x15b   : > { %2299 = vpow2.f32 %v2187_v58  ;;  %v1012_v2 = vsel %vm1011_vm9, %v2294_v38, %v1008_v12  ;;  %v1020_v4 = vmul.f32 %v2298_v29, %v2844_v5  ;;  %vm1025_vm11 = vweird.f32 %v2298_v29 }
 0x15c   : > { %2301 = vrcp.f32 %v2862_v1  ;;  %v1017_v10 = vsel %vm1014_vm10, %v1016_v59, %v1012_v2  ;;  %vm1026_vm13 = vmor %vm1024_vm12, %vm1025_vm11  ;;  %v1045_v39 = vand.u32 2147483648, %v2862_v1  ;;  %v1043_v7 = vand.u32 2147483647, %v2862_v1 }
 0x15d   : > { %2201 = vmatmul.msk.f32.gmra.mxu3 %vm1235_vm5, %v1017_v10  ;;  %v1021_v45 = vsub.f32 1.0, %v1020_v4  ;;  %vm1039_vm0 = vweird.f32 %v2862_v1 }
 0x15e   : > { %v892_v60 = vpop.f32.mrf.mxu2  ;;  %v1046_v51 = vor.u32 1.1754944e-38, %v1045_v39  ;;  %vm1044_vm2 = vcmp.eq.f32.partialorder %v1043_v7, 8.507059e+37 }
 0x15f   : > { %v893_v47 = vadd.f32 %v892_v60, %v828_v42  ;;  %v1022_v63 = vmul.f32 %v2298_v29, %v1021_v45  ;;  %v712_v42 = vpop.f32.mrf.mxu3  ;;  %v772_v60 = vadd.f32 %v2875_v43, %v707_v40 }
 0x160   : > { %v830_v25 = vpop.f32.mrf.mxu1 }
 0x161   : > { %v2300_v27 = vpop.eup %2299  ;;  %v2188_v15 = vmul.f32 -1.442695, %v893_v47  ;;  %v1023_v57 = vadd.f32 %v2298_v29, %v1022_v63  ;;  %v831_v5 = vadd.f32 %v830_v25, %v766_v36 }
 0x162   : > { %v2302_v19 = vpop.eup %2301  ;;  %v2880_v31 = vadd.f32 1.0, %v2300_v27  ;;  %v710_v27 = vadd.f32 %v709_v0, %v2769_v37 }
 0x163   : > { %2303 = vpow2.f32 %v2188_v15  ;;  %v1027_v17 = vsel %vm1026_vm13, %v2298_v29, %v1023_v57  ;;  %v1035_v9 = vmul.f32 %v2302_v19, %v2862_v1  ;;  %vm1040_vm15 = vweird.f32 %v2302_v19 }
 0x164   : > { %2305 = vrcp.f32 %v2880_v31  ;;  %v1032_v38 = vsel %vm1029_vm14, %v1031_v21, %v1027_v17  ;;  %vm1041_vm1 = vmor %vm1039_vm0, %vm1040_vm15  ;;  %v1060_v53 = vand.u32 2147483648, %v2880_v31  ;;  %v1058_v2 = vand.u32 2147483647, %v2880_v31 }
 0x165   : > { %2202 = vmatmul.msk.f32.gmra.mxu3 %vm1235_vm5, %v1032_v38  ;;  %v1036_v13 = vsub.f32 1.0, %v1035_v9  ;;  %vm1054_vm4 = vweird.f32 %v2880_v31  ;;  %v775_v38 = vadd.f32 %v774_v56, %v710_v27 }
 0x166   : > { %v895_v22 = vpop.f32.mrf.mxu2  ;;  %v1061_v26 = vor.u32 1.1754944e-38, %v1060_v53  ;;  %vm1059_vm7 = vcmp.eq.f32.partialorder %v1058_v2, 8.507059e+37 }
 0x167   : > { %v896_v48 = vadd.f32 %v895_v22, %v831_v5  ;;  %v1037_v52 = vmul.f32 %v2302_v19, %v1036_v13  ;;  %v715_v13 = vpop.f32.mrf.mxu3 }
 0x168   : > { %v833_v3 = vpop.f32.mrf.mxu1 }
 0x169   : > { %v2304_v32 = vpop.eup %2303  ;;  %v2189_v28 = vmul.f32 -1.442695, %v896_v48  ;;  %v1038_v50 = vadd.f32 %v2302_v19, %v1037_v52  ;;  %v834_v12 = vadd.f32 %v833_v3, %v769_v55  ;;  %v713_v48 = vadd.f32 %v712_v42, %v2777_v46  ;;  %v780_v3 = vpop.f32.mrf.mxu0 }
 0x16a   : > { %v2306_v54 = vpop.eup %2305  ;;  %v978_v24 = vadd.f32 1.0, %v2304_v32 }
 0x16b   : > { %2307 = vpow2.f32 %v2189_v28  ;;  %v1042_v34 = vsel %vm1041_vm1, %v2302_v19, %v1038_v50  ;;  %v1050_v35 = vmul.f32 %v2306_v54, %v2880_v31  ;;  %vm1055_vm3 = vweird.f32 %v2306_v54 }
 0x16c   : > { %2309 = vrcp.f32 %v978_v24  ;;  %v1047_v58 = vsel %vm1044_vm2, %v1046_v51, %v1042_v34  ;;  %vm1056_vm6 = vmor %vm1054_vm4, %vm1055_vm3  ;;  %v1075_v57 = vand.u32 2147483648, %v978_v24  ;;  %v1073_v36 = vand.u32 2147483647, %v978_v24 }
 0x16d   : > { %2203 = vmatmul.msk.f32.gmra.mxu3 %vm1235_vm5, %v1047_v58  ;;  %v1051_v29 = vsub.f32 1.0, %v1050_v35  ;;  %vm1069_vm9 = vweird.f32 %v978_v24  ;;  %v778_v34 = vadd.f32 %v777_v18, %v713_v48 }
 0x16e   : > { %v898_v44 = vpop.f32.mrf.mxu2  ;;  %v1076_v5 = vor.u32 1.1754944e-38, %v1075_v57  ;;  %vm1074_vm11 = vcmp.eq.f32.partialorder %v1073_v36, 8.507059e+37 }
 0x16f   : > { %v899_v1 = vadd.f32 %v898_v44, %v834_v12  ;;  %v1052_v59 = vmul.f32 %v2306_v54, %v1051_v29  ;;  %v718_v40 = vpop.f32.mrf.mxu3 }
 0x170   : > { %v836_v4 = vpop.f32.mrf.mxu1 }
 0x171   : > { %v2308_v10 = vpop.eup %2307  ;;  %v2190_v45 = vmul.f32 -1.442695, %v899_v1  ;;  %v1053_v8 = vadd.f32 %v2306_v54, %v1052_v59  ;;  %v837_v20 = vadd.f32 %v836_v4, %v772_v60  ;;  %v716_v1 = vadd.f32 %v715_v13, %v2784_v61 }
 0x172   : > { %v2310_v14 = vpop.eup %2309  ;;  %v979_v62 = vadd.f32 1.0, %v2308_v10 }
 0x173   : > { %2311 = vpow2.f32 %v2190_v45  ;;  %v1057_v16 = vsel %vm1056_vm6, %v2306_v54, %v1053_v8  ;;  %v1065_v47 = vmul.f32 %v2310_v14, %v978_v24  ;;  %vm1070_vm8 = vweird.f32 %v2310_v14 }
 0x174   : > { %2313 = vrcp.f32 %v979_v62  ;;  %v1062_v63 = vsel %vm1059_vm7, %v1061_v26, %v1057_v16  ;;  %vm1071_vm10 = vmor %vm1069_vm9, %vm1070_vm8  ;;  %v1090_v7 = vand.u32 2147483648, %v979_v62  ;;  %v1088_v50 = vand.u32 2147483647, %v979_v62 }
 0x175   : > { %2204 = vmatmul.msk.f32.gmra.mxu3 %vm1235_vm5, %v1062_v63  ;;  %v1066_v25 = vsub.f32 1.0, %v1065_v47  ;;  %vm1084_vm13 = vweird.f32 %v979_v62  ;;  %v781_v16 = vadd.f32 %v780_v3, %v716_v1 }
 0x176   : > { %v901_v15 = vpop.f32.mrf.mxu2  ;;  %v1091_v58 = vor.u32 1.1754944e-38, %v1090_v7  ;;  %vm1089_vm15 = vcmp.eq.f32.partialorder %v1088_v50, 8.507059e+37 }
 0x177   : > { %v902_v19 = vadd.f32 %v901_v15, %v837_v20  ;;  %v1067_v43 = vmul.f32 %v2310_v14, %v1066_v25  ;;  %v719_v15 = vadd.f32 %v718_v40, %v2790_v11  ;;  %v1657_v40 = vld [vmem:[%s3042_s5] sm:$0xff] }
 0x178   : > { %v839_v41 = vpop.f32.mrf.mxu1  ;;  %1729 = vmatpush.msra.mxu0 %v1657_v40 }
 0x179   : > { %v2312_v31 = vpop.eup %2311  ;;  %v2191_v21 = vmul.f32 -1.442695, %v902_v19  ;;  %v1068_v17 = vadd.f32 %v2310_v14, %v1067_v43  ;;  %v840_v39 = vadd.f32 %v839_v41, %v775_v38  ;;  %v721_v43 = vpop.f32.mrf.mxu3 }
 0x17a   : > { %v2314_v9 = vpop.eup %2313  ;;  %v980_v33 = vadd.f32 1.0, %v2312_v31 }
 0x17b   : > { %2315 = vpow2.f32 %v2191_v21  ;;  %v1072_v23 = vsel %vm1071_vm10, %v2310_v14, %v1068_v17  ;;  %v1080_v37 = vmul.f32 %v2314_v9, %v979_v62  ;;  %vm1085_vm12 = vweird.f32 %v2314_v9  ;;  %v783_v14 = vpop.f32.mrf.mxu0 }
 0x17c   : > { %2317 = vrcp.f32 %v980_v33  ;;  %v1077_v22 = vsel %vm1074_vm11, %v1076_v5, %v1072_v23  ;;  %vm1086_vm14 = vmor %vm1084_vm13, %vm1085_vm12  ;;  %v1105_v2 = vand.u32 2147483648, %v980_v33  ;;  %v1103_v42 = vand.u32 2147483647, %v980_v33 }
 0x17d   : > { %2205 = vmatmul.msk.f32.gmra.mxu3 %vm1235_vm5, %v1077_v22  ;;  %v1081_v0 = vsub.f32 1.0, %v1080_v37  ;;  %vm1099_vm1 = vweird.f32 %v980_v33  ;;  %v784_v5 = vadd.f32 %v783_v14, %v719_v15 }
 0x17e   : > { %v904_v52 = vpop.f32.mrf.mxu2  ;;  %v1106_v63 = vor.u32 1.1754944e-38, %v1105_v2  ;;  %vm1104_vm3 = vcmp.eq.f32.partialorder %v1103_v42, 8.507059e+37 }
 0x17f   : > { %v905_v32 = vadd.f32 %v904_v52, %v840_v39  ;;  %v1082_v28 = vmul.f32 %v2314_v9, %v1081_v0  ;;  %v722_v52 = vadd.f32 %v721_v43, %v2796_v30 }
 0x180   : > { %v842_v54 = vpop.f32.mrf.mxu1 }
 0x181   : > { %v2316_v55 = vpop.eup %2315  ;;  %v2192_v24 = vmul.f32 -1.442695, %v905_v32  ;;  %v1083_v51 = vadd.f32 %v2314_v9, %v1082_v28  ;;  %v843_v44 = vadd.f32 %v842_v54, %v778_v34 }
 0x182   : > { %v2318_v56 = vpop.eup %2317  ;;  %v981_v35 = vadd.f32 1.0, %v2316_v55 }
 0x183   : > { %2319 = vpow2.f32 %v2192_v24  ;;  %v1087_v12 = vsel %vm1086_vm14, %v2314_v9, %v1083_v51  ;;  %v1095_v46 = vmul.f32 %v2318_v56, %v980_v33  ;;  %vm1100_vm0 = vweird.f32 %v2318_v56  ;;  %v786_v37 = vpop.f32.mrf.mxu0  ;;  %v724_v24 = vpop.f32.mrf.mxu3 }
 0x184   : > { %2321 = vrcp.f32 %v981_v35  ;;  %v1092_v29 = vsel %vm1089_vm15, %v1091_v58, %v1087_v12  ;;  %vm1101_vm2 = vmor %vm1099_vm1, %vm1100_vm0  ;;  %v1120_v19 = vand.u32 2147483648, %v981_v35  ;;  %v1118_v31 = vand.u32 2147483647, %v981_v35 }
 0x185   : > { %2206 = vmatmul.msk.f32.gmra.mxu3 %vm1235_vm5, %v1092_v29  ;;  %v1096_v53 = vsub.f32 1.0, %v1095_v46  ;;  %vm1114_vm6 = vweird.f32 %v981_v35 }
 0x186   : > { %v907_v59 = vpop.f32.mrf.mxu2  ;;  %v1121_v23 = vor.u32 1.1754944e-38, %v1120_v19  ;;  %vm1119_vm8 = vcmp.eq.f32.partialorder %v1118_v31, 8.507059e+37 }
 0x187   : > { %v908_v4 = vadd.f32 %v907_v59, %v843_v44  ;;  %v1097_v10 = vmul.f32 %v2318_v56, %v1096_v53  ;;  %v725_v59 = vadd.f32 %v724_v24, %v2805_v49 }
 0x188   : > { %v845_v45 = vpop.f32.mrf.mxu1 }
 0x189   : > { %v2320_v8 = vpop.eup %2319  ;;  %v2193_v60 = vmul.f32 -1.442695, %v908_v4  ;;  %v1098_v62 = vadd.f32 %v2318_v56, %v1097_v10  ;;  %v846_v25 = vadd.f32 %v845_v45, %v781_v16 }
 0x18a   : > { %v2322_v26 = vpop.eup %2321  ;;  %v982_v47 = vadd.f32 1.0, %v2320_v8 }
 0x18b   : > { %2323 = vpow2.f32 %v2193_v60  ;;  %v1102_v18 = vsel %vm1101_vm2, %v2318_v56, %v1098_v62  ;;  %v1110_v61 = vmul.f32 %v2322_v26, %v981_v35  ;;  %vm1115_vm4 = vweird.f32 %v2322_v26  ;;  %v789_v44 = vpop.f32.mrf.mxu0  ;;  %v727_v49 = vpop.f32.mrf.mxu3 }
 0x18c   : > { %2325 = vrcp.f32 %v982_v47  ;;  %v1107_v20 = vsel %vm1104_vm3, %v1106_v63, %v1102_v18  ;;  %vm1116_vm7 = vmor %vm1114_vm6, %vm1115_vm4  ;;  %v1135_v3 = vand.u32 2147483648, %v982_v47  ;;  %v1133_v50 = vand.u32 2147483647, %v982_v47 }
 0x18d   : > { %2207 = vmatmul.msk.f32.gmra.mxu3 %vm1235_vm5, %v1107_v20  ;;  %v1111_v27 = vsub.f32 1.0, %v1110_v61  ;;  %vm1129_vm10 = vweird.f32 %v982_v47  ;;  %v787_v35 = vadd.f32 %v786_v37, %v722_v52  ;;  %v790_v16 = vadd.f32 %v789_v44, %v725_v59 }
 0x18e   : > { %v910_v57 = vpop.f32.mrf.mxu2  ;;  %v1136_v12 = vor.u32 1.1754944e-38, %v1135_v3  ;;  %vm1134_vm12 = vcmp.eq.f32.partialorder %v1133_v50, 8.507059e+37  ;;  %v728_v15 = vadd.f32 %v727_v49, %v2814_v6 }
 0x18f   : > { %v911_v36 = vadd.f32 %v910_v57, %v846_v25  ;;  %v1112_v41 = vmul.f32 %v2322_v26, %v1111_v27 }
 0x190   : > { %v848_v21 = vpop.f32.mrf.mxu1 }
 0x191   : > { %v2324_v17 = vpop.eup %2323  ;;  %v2194_v9 = vmul.f32 -1.442695, %v911_v36  ;;  %v1113_v38 = vadd.f32 %v2322_v26, %v1112_v41  ;;  %v849_v0 = vadd.f32 %v848_v21, %v784_v5 }
 0x192   : > { %v2326_v33 = vpop.eup %2325  ;;  %v2910_v13 = vadd.f32 1.0, %v2324_v17 }
 0x193   : > { %2327 = vpow2.f32 %v2194_v9  ;;  %v1117_v11 = vsel %vm1116_vm7, %v2322_v26, %v1113_v38  ;;  %v1125_v22 = vmul.f32 %v2326_v33, %v982_v47  ;;  %vm1130_vm9 = vweird.f32 %v2326_v33  ;;  %v792_v43 = vpop.f32.mrf.mxu0 }
 0x194   : > { %2329 = vrcp.f32 %v2910_v13  ;;  %v1122_v39 = vsel %vm1119_vm8, %v1121_v23, %v1117_v11  ;;  %vm1131_vm11 = vmor %vm1129_vm10, %vm1130_vm9  ;;  %v1150_v4 = vand.u32 2147483648, %v2910_v13  ;;  %v1148_v45 = vand.u32 2147483647, %v2910_v13 }
 0x195   : > { %2208 = vmatmul.msk.f32.gmra.mxu3 %vm1235_vm5, %v1122_v39  ;;  %v1126_v48 = vsub.f32 1.0, %v1125_v22  ;;  %vm1144_vm14 = vweird.f32 %v2910_v13 }
 0x196   : > { %v913_v7 = vpop.f32.mrf.mxu2  ;;  %v1151_v63 = vor.u32 1.1754944e-38, %v1150_v4  ;;  %vm1149_vm0 = vcmp.eq.f32.partialorder %v1148_v45, 8.507059e+37 }
 0x197   : > { %v914_v32 = vadd.f32 %v913_v7, %v849_v0  ;;  %v1127_v28 = vmul.f32 %v2326_v33, %v1126_v48 }
 0x198   : > { %v851_v54 = vpop.f32.mrf.mxu1 }
 0x199   : > { %v2328_v55 = vpop.eup %2327  ;;  %v2195_v51 = vmul.f32 -1.442695, %v914_v32  ;;  %v1128_v56 = vadd.f32 %v2326_v33, %v1127_v28  ;;  %v852_v53 = vadd.f32 %v851_v54, %v787_v35 }
 0x19a   : > { %v2330_v34 = vpop.eup %2329  ;;  %v2915_v58 = vadd.f32 1.0, %v2328_v55 }
 0x19b   : > { %2331 = vpow2.f32 %v2195_v51  ;;  %v1132_v30 = vsel %vm1131_vm11, %v2326_v33, %v1128_v56  ;;  %v1140_v46 = vmul.f32 %v2330_v34, %v2910_v13  ;;  %vm1145_vm13 = vweird.f32 %v2330_v34 }
 0x19c   : > { %2333 = vrcp.f32 %v2915_v58  ;;  %v1137_v29 = vsel %vm1134_vm12, %v1136_v12, %v1132_v30  ;;  %vm1146_vm15 = vmor %vm1144_vm14, %vm1145_vm13  ;;  %v1165_v19 = vand.u32 2147483648, %v2915_v58  ;;  %v1163_v31 = vand.u32 2147483647, %v2915_v58 }
 0x19d   : > { %2209 = vmatmul.msk.f32.gmra.mxu3 %vm1235_vm5, %v1137_v29  ;;  %v1141_v1 = vsub.f32 1.0, %v1140_v46  ;;  %vm1159_vm2 = vweird.f32 %v2915_v58  ;;  %v793_v33 = vadd.f32 %v792_v43, %v728_v15  ;;  %v2941_v15 = vld [vmem:[%s3041_s4] ss:$0 sm:$0xff] }
 0x19e   : > { %v916_v2 = vpop.f32.mrf.mxu2  ;;  %v1166_v6 = vor.u32 1.1754944e-38, %v1165_v19  ;;  %vm1164_vm4 = vcmp.eq.f32.partialorder %v1163_v31, 8.507059e+37 }
 0x19f   : > { %v917_v10 = vadd.f32 %v916_v2, %v852_v53  ;;  %v1142_v42 = vmul.f32 %v2330_v34, %v1141_v1 }
 0x1a0   : > { %v854_v8 = vpop.f32.mrf.mxu1 }
 0x1a1   : > { %v2332_v14 = vpop.eup %2331  ;;  %v2196_v60 = vmul.f32 -1.442695, %v917_v10  ;;  %v1143_v62 = vadd.f32 %v2330_v34, %v1142_v42  ;;  %v855_v25 = vadd.f32 %v854_v8, %v790_v16 }
 0x1a2   : > { %v2334_v26 = vpop.eup %2333  ;;  %v985_v47 = vadd.f32 1.0, %v2332_v14 }
 0x1a3   : > { %2335 = vpow2.f32 %v2196_v60  ;;  %v1147_v18 = vsel %vm1146_vm15, %v2330_v34, %v1143_v62  ;;  %v1155_v61 = vmul.f32 %v2334_v26, %v2915_v58  ;;  %vm1160_vm1 = vweird.f32 %v2334_v26 }
 0x1a4   : > { %2337 = vrcp.f32 %v985_v47  ;;  %v1152_v20 = vsel %vm1149_vm0, %v1151_v63, %v1147_v18  ;;  %vm1161_vm3 = vmor %vm1159_vm2, %vm1160_vm1  ;;  %v1180_v48 = vand.u32 2147483648, %v985_v47  ;;  %v1178_v3 = vand.u32 2147483647, %v985_v47 }
 0x1a5   : > { %2210 = vmatmul.msk.f32.gmra.mxu3 %vm1235_vm5, %v1152_v20  ;;  %v1156_v27 = vsub.f32 1.0, %v1155_v61  ;;  %vm1174_vm7 = vweird.f32 %v985_v47 }
 0x1a6   : > { %v919_v57 = vpop.f32.mrf.mxu2  ;;  %v1181_v24 = vor.u32 1.1754944e-38, %v1180_v48  ;;  %vm1179_vm9 = vcmp.eq.f32.partialorder %v1178_v3, 8.507059e+37 }
 0x1a7   : > { %v920_v36 = vadd.f32 %v919_v57, %v855_v25  ;;  %v1157_v41 = vmul.f32 %v2334_v26, %v1156_v27 }
 0x1a8   : > { %v857_v13 = vpop.f32.mrf.mxu1 }
 0x1a9   : > { %v2336_v21 = vpop.eup %2335  ;;  %v2197_v17 = vmul.f32 -1.442695, %v920_v36  ;;  %v1158_v9 = vadd.f32 %v2334_v26, %v1157_v41  ;;  %v858_v22 = vadd.f32 %v857_v13, %v793_v33 }
 0x1aa   : > { %v2338_v38 = vpop.eup %2337  ;;  %v986_v5 = vadd.f32 1.0, %v2336_v21 }
 0x1ab   : > { %2339 = vpow2.f32 %v2197_v17  ;;  %v1162_v23 = vsel %vm1161_vm3, %v2334_v26, %v1158_v9  ;;  %v1170_v37 = vmul.f32 %v2338_v38, %v985_v47  ;;  %vm1175_vm6 = vweird.f32 %v2338_v38 }
 0x1ac   : > { %2341 = vrcp.f32 %v986_v5  ;;  %v1167_v11 = vsel %vm1164_vm4, %v1166_v6, %v1162_v23  ;;  %vm1176_vm8 = vmor %vm1174_vm7, %vm1175_vm6  ;;  %v1195_v58 = vand.u32 2147483648, %v986_v5  ;;  %v1193_v30 = vand.u32 2147483647, %v986_v5 }
 0x1ad   : > { %2211 = vmatmul.msk.f32.gmra.mxu3 %vm1235_vm5, %v1167_v11  ;;  %v1171_v39 = vsub.f32 1.0, %v1170_v37  ;;  %vm1189_vm11 = vweird.f32 %v986_v5 }
 0x1ae   : > { %v922_v0 = vpop.f32.mrf.mxu2  ;;  %v1196_v53 = vor.u32 1.1754944e-38, %v1195_v58  ;;  %vm1194_vm13 = vcmp.eq.f32.partialorder %v1193_v30, 8.507059e+37 }
 0x1af   : > { %v923_v52 = vadd.f32 %v922_v0, %v858_v22  ;;  %v1172_v7 = vmul.f32 %v2338_v38, %v1171_v39 }
 0x1b1   : > { %v2340_v32 = vpop.eup %2339  ;;  %v2198_v28 = vmul.f32 -1.442695, %v923_v52  ;;  %v1173_v50 = vadd.f32 %v2338_v38, %v1172_v7 }
 0x1b2   : > { %v2342_v54 = vpop.eup %2341  ;;  %v987_v55 = vadd.f32 1.0, %v2340_v32 }
 0x1b3   : > { %2343 = vpow2.f32 %v2198_v28  ;;  %v1177_v51 = vsel %vm1176_vm8, %v2338_v38, %v1173_v50  ;;  %v1185_v56 = vmul.f32 %v2342_v54, %v986_v5  ;;  %vm1190_vm10 = vweird.f32 %v2342_v54 }
 0x1b4   : > { %2345 = vrcp.f32 %v987_v55  ;;  %v1182_v34 = vsel %vm1179_vm9, %v1181_v24, %v1177_v51  ;;  %vm1191_vm12 = vmor %vm1189_vm11, %vm1190_vm10  ;;  %v1210_v10 = vand.u32 2147483648, %v987_v55  ;;  %v1208_v45 = vand.u32 2147483647, %v987_v55 }
 0x1b5   : > { %2212 = vmatmul.msk.f32.gmra.mxu3 %vm1235_vm5, %v1182_v34  ;;  %v1186_v35 = vsub.f32 1.0, %v1185_v56  ;;  %vm1204_vm15 = vweird.f32 %v987_v55 }
 0x1b6   : > { %v1211_v60 = vor.u32 1.1754944e-38, %v1210_v10  ;;  %vm1209_vm1 = vcmp.eq.f32.partialorder %v1208_v45, 8.507059e+37 }
 0x1b7   : > { %v1187_v12 = vmul.f32 %v2342_v54, %v1186_v35 }
 0x1b9   : > { %v2344_v46 = vpop.eup %2343  ;;  %v1188_v29 = vadd.f32 %v2342_v54, %v1187_v12 }
 0x1ba   : > { %v2346_v40 = vpop.eup %2345  ;;  %v988_v44 = vadd.f32 1.0, %v2344_v46 }
 0x1bb   : > { %v1192_v1 = vsel %vm1191_vm12, %v2342_v54, %v1188_v29  ;;  %v1200_v59 = vmul.f32 %v2346_v40, %v987_v55  ;;  %vm1205_vm14 = vweird.f32 %v2346_v40 }
 0x1bc   : > { %2347 = vrcp.f32 %v988_v44  ;;  %v1197_v2 = vsel %vm1194_vm13, %v1196_v53, %v1192_v1  ;;  %vm1206_vm0 = vmor %vm1204_vm15, %vm1205_vm14  ;;  %v1225_v63 = vand.u32 2147483648, %v988_v44  ;;  %v1223_v18 = vand.u32 2147483647, %v988_v44 }
 0x1bd   : > { %2213 = vmatmul.msk.f32.gmra.mxu3 %vm1235_vm5, %v1197_v2  ;;  %v1201_v4 = vsub.f32 1.0, %v1200_v59  ;;  %vm1219_vm3 = vweird.f32 %v988_v44 }
 0x1be   : > { %v1226_v20 = vor.u32 1.1754944e-38, %v1225_v63  ;;  %vm1224_vm6 = vcmp.eq.f32.partialorder %v1223_v18, 8.507059e+37 }
 0x1bf   : > { %v1202_v42 = vmul.f32 %v2346_v40, %v1201_v4 }
 0x1c1   : > { %v1203_v8 = vadd.f32 %v2346_v40, %v1202_v42 }
 0x1c2   : > { %v2348_v14 = vpop.eup %2347 }
 0x1c3   : > { %v1207_v62 = vsel %vm1206_vm0, %v2346_v40, %v1203_v8  ;;  %v1215_v26 = vmul.f32 %v2348_v14, %v988_v44  ;;  %vm1220_vm2 = vweird.f32 %v2348_v14 }
 0x1c4   : > { %v1212_v16 = vsel %vm1209_vm1, %v1211_v60, %v1207_v62  ;;  %vm1221_vm4 = vmor %vm1219_vm3, %vm1220_vm2 }
 0x1c5   : > { %2214 = vmatmul.msk.f32.gmra.mxu3 %vm1235_vm5, %v1212_v16  ;;  %v1216_v47 = vsub.f32 1.0, %v1215_v26 }
 0x1c7   : > { %v1217_v49 = vmul.f32 %v2348_v14, %v1216_v47 }
 0x1c9   : > { %v1218_v61 = vadd.f32 %v2348_v14, %v1217_v49 }
 0x1cb   : > { %v1222_v25 = vsel %vm1221_vm4, %v2348_v14, %v1218_v61 }
 0x1cc   : > { %v1227_v27 = vsel %vm1224_vm6, %v1226_v20, %v1222_v25 }
 0x1cd   : > { %2215 = vmatmul.msk.f32.gmra.mxu3 %vm1235_vm5, %v1227_v27 }
 0x1d8   : > { %v1305_v57 = vpop.f32.mrf.mxu3 }
 0x1d9   : > { %v1306_v19 = vadd.f32 %v2941_v15, %v1305_v57 }
 0x1db   : > { %v2216_v43 = vmul.f32 -1.442695, %v1306_v19 }
 0x1dd   : > { %2349 = vpow2.f32 %v2216_v43 }
 0x1e0   : > { %v1308_v36 = vpop.f32.mrf.mxu3 }
 0x1e1   : > { %v1309_v41 = vadd.f32 %v2941_v15, %v1308_v36 }
 0x1e3   : > { %v2350_v31 = vpop.eup %2349  ;;  %v2217_v21 = vmul.f32 -1.442695, %v1309_v41 }
 0x1e4   : > { %v1401_v17 = vadd.f32 1.0, %v2350_v31 }
 0x1e5   : > { %2351 = vpow2.f32 %v2217_v21 }
 0x1e6   : > { %2353 = vrcp.f32 %v1401_v17  ;;  %v1428_v22 = vand.u32 2147483648, %v1401_v17  ;;  %v1426_v48 = vand.u32 2147483647, %v1401_v17  ;;  %vm1422_vm8 = vweird.f32 %v1401_v17 }
 0x1e8   : > { %v1311_v9 = vpop.f32.mrf.mxu3  ;;  %v1429_v50 = vor.u32 1.1754944e-38, %v1428_v22  ;;  %vm1427_vm10 = vcmp.eq.f32.partialorder %v1426_v48, 8.507059e+37 }
 0x1e9   : > { %v1312_v38 = vadd.f32 %v2941_v15, %v1311_v9 }
 0x1eb   : > { %v2352_v33 = vpop.eup %2351  ;;  %v2218_v5 = vmul.f32 -1.442695, %v1312_v38 }
 0x1ec   : > { %v2354_v13 = vpop.eup %2353  ;;  %v1402_v6 = vadd.f32 1.0, %v2352_v33 }
 0x1ed   : > { %v1418_v23 = vmul.f32 %v2354_v13, %v1401_v17  ;;  %2355 = vpow2.f32 %v2218_v5  ;;  %vm1423_vm7 = vweird.f32 %v2354_v13 }
 0x1ee   : > { %2357 = vrcp.f32 %v1402_v6  ;;  %vm1424_vm9 = vmor %vm1422_vm8, %vm1423_vm7  ;;  %v1443_v34 = vand.u32 2147483648, %v1402_v6  ;;  %v1441_v12 = vand.u32 2147483647, %v1402_v6  ;;  %vm1437_vm12 = vweird.f32 %v1402_v6 }
 0x1ef   : > { %v1419_v37 = vsub.f32 1.0, %v1418_v23 }
 0x1f0   : > { %v1314_v11 = vpop.f32.mrf.mxu3  ;;  %v1444_v53 = vor.u32 1.1754944e-38, %v1443_v34  ;;  %vm1442_vm14 = vcmp.eq.f32.partialorder %v1441_v12, 8.507059e+37 }
 0x1f1   : > { %v1315_v39 = vadd.f32 %v2941_v15, %v1314_v11  ;;  %v1420_v0 = vmul.f32 %v2354_v13, %v1419_v37 }
 0x1f3   : > { %v2356_v52 = vpop.eup %2355  ;;  %v2219_v7 = vmul.f32 -1.442695, %v1315_v39  ;;  %v1421_v3 = vadd.f32 %v2354_v13, %v1420_v0 }
 0x1f4   : > { %v2358_v32 = vpop.eup %2357  ;;  %v1403_v28 = vadd.f32 1.0, %v2356_v52 }
 0x1f5   : > { %2359 = vpow2.f32 %v2219_v7  ;;  %v1425_v54 = vsel %vm1424_vm9, %v2354_v13, %v1421_v3  ;;  %v1433_v55 = vmul.f32 %v2358_v32, %v1402_v6  ;;  %vm1438_vm11 = vweird.f32 %v2358_v32 }
 0x1f6   : > { %2361 = vrcp.f32 %v1403_v28  ;;  %v1430_v24 = vsel %vm1427_vm10, %v1429_v50, %v1425_v54  ;;  %vm1439_vm13 = vmor %vm1437_vm12, %vm1438_vm11  ;;  %v1458_v42 = vand.u32 2147483648, %v1403_v28  ;;  %v1456_v14 = vand.u32 2147483647, %v1403_v28 }
 0x1f7   : > { %2233 = vmatmul.msk.f32.vlgmr.msra.gmra.mxu0 %vm1235_vm5, %v1430_v24  ;;  %v1434_v51 = vsub.f32 1.0, %v1433_v55  ;;  %vm1452_vm0 = vweird.f32 %v1403_v28 }
 0x1f8   : > { %v1317_v56 = vpop.f32.mrf.mxu3  ;;  %v1459_v63 = vor.u32 1.1754944e-38, %v1458_v42  ;;  %vm1457_vm2 = vcmp.eq.f32.partialorder %v1456_v14, 8.507059e+37 }
 0x1f9   : > { %v1318_v35 = vadd.f32 %v2941_v15, %v1317_v56  ;;  %v1435_v58 = vmul.f32 %v2358_v32, %v1434_v51 }
 0x1fb   : > { %v2360_v30 = vpop.eup %2359  ;;  %v2220_v46 = vmul.f32 -1.442695, %v1318_v35  ;;  %v1436_v29 = vadd.f32 %v2358_v32, %v1435_v58 }
 0x1fc   : > { %v2362_v40 = vpop.eup %2361  ;;  %v1404_v44 = vadd.f32 1.0, %v2360_v30 }
 0x1fd   : > { %2363 = vpow2.f32 %v2220_v46  ;;  %v1440_v1 = vsel %vm1439_vm13, %v2358_v32, %v1436_v29  ;;  %v1448_v59 = vmul.f32 %v2362_v40, %v1403_v28  ;;  %vm1453_vm15 = vweird.f32 %v2362_v40 }
 0x1fe   : > { %2365 = vrcp.f32 %v1404_v44  ;;  %v1445_v2 = vsel %vm1442_vm14, %v1444_v53, %v1440_v1  ;;  %vm1454_vm1 = vmor %vm1452_vm0, %vm1453_vm15  ;;  %v1473_v27 = vand.u32 2147483648, %v1404_v44  ;;  %v1471_v43 = vand.u32 2147483647, %v1404_v44 }
 0x1ff   : > { %2234 = vmatmul.msk.f32.gmra.mxu0 %vm1235_vm5, %v1445_v2  ;;  %v1449_v4 = vsub.f32 1.0, %v1448_v59  ;;  %vm1467_vm4 = vweird.f32 %v1404_v44 }
 0x200   : > { %v1320_v10 = vpop.f32.mrf.mxu3  ;;  %v1474_v9 = vor.u32 1.1754944e-38, %v1473_v27  ;;  %vm1472_vm7 = vcmp.eq.f32.partialorder %v1471_v43, 8.507059e+37 }
 0x201   : > { %v1321_v45 = vadd.f32 %v2941_v15, %v1320_v10  ;;  %v1450_v8 = vmul.f32 %v2362_v40, %v1449_v4 }
 0x203   : > { %v2364_v60 = vpop.eup %2363  ;;  %v2221_v62 = vmul.f32 -1.442695, %v1321_v45  ;;  %v1451_v26 = vadd.f32 %v2362_v40, %v1450_v8 }
 0x204   : > { %v2366_v16 = vpop.eup %2365  ;;  %v1405_v47 = vadd.f32 1.0, %v2364_v60 }
 0x205   : > { %2367 = vpow2.f32 %v2221_v62  ;;  %v1455_v49 = vsel %vm1454_vm1, %v2362_v40, %v1451_v26  ;;  %v1463_v18 = vmul.f32 %v2366_v16, %v1404_v44  ;;  %vm1468_vm3 = vweird.f32 %v2366_v16 }
 0x206   : > { %2369 = vrcp.f32 %v1405_v47  ;;  %v1460_v61 = vsel %vm1457_vm2, %v1459_v63, %v1455_v49  ;;  %vm1469_vm6 = vmor %vm1467_vm4, %vm1468_vm3  ;;  %v1488_v23 = vand.u32 2147483648, %v1405_v47  ;;  %v1486_v22 = vand.u32 2147483647, %v1405_v47 }
 0x207   : > { %2235 = vmatmul.msk.f32.gmra.mxu0 %vm1235_vm5, %v1460_v61  ;;  %v1464_v20 = vsub.f32 1.0, %v1463_v18  ;;  %vm1482_vm9 = vweird.f32 %v1405_v47 }
 0x208   : > { %v1323_v25 = vpop.f32.mrf.mxu3  ;;  %v1489_v3 = vor.u32 1.1754944e-38, %v1488_v23  ;;  %vm1487_vm11 = vcmp.eq.f32.partialorder %v1486_v22, 8.507059e+37 }
 0x209   : > { %v1324_v57 = vadd.f32 %v2941_v15, %v1323_v25  ;;  %v1465_v19 = vmul.f32 %v2366_v16, %v1464_v20 }
 0x20b   : > { %v2368_v36 = vpop.eup %2367  ;;  %v2222_v41 = vmul.f32 -1.442695, %v1324_v57  ;;  %v1466_v31 = vadd.f32 %v2366_v16, %v1465_v19 }
 0x20c   : > { %v2370_v21 = vpop.eup %2369  ;;  %v1406_v17 = vadd.f32 1.0, %v2368_v36 }
 0x20d   : > { %2371 = vpow2.f32 %v2222_v41  ;;  %v1470_v38 = vsel %vm1469_vm6, %v2366_v16, %v1466_v31  ;;  %v1478_v33 = vmul.f32 %v2370_v21, %v1405_v47  ;;  %vm1483_vm8 = vweird.f32 %v2370_v21 }
 0x20e   : > { %2373 = vrcp.f32 %v1406_v17  ;;  %v1475_v5 = vsel %vm1472_vm7, %v1474_v9, %v1470_v38  ;;  %vm1484_vm10 = vmor %vm1482_vm9, %vm1483_vm8  ;;  %v1503_v24 = vand.u32 2147483648, %v1406_v17  ;;  %v1501_v34 = vand.u32 2147483647, %v1406_v17 }
 0x20f   : > { %2236 = vmatmul.msk.f32.gmra.mxu0 %vm1235_vm5, %v1475_v5  ;;  %v1479_v13 = vsub.f32 1.0, %v1478_v33  ;;  %vm1497_vm13 = vweird.f32 %v1406_v17 }
 0x210   : > { %v1326_v6 = vpop.f32.mrf.mxu3  ;;  %v1504_v29 = vor.u32 1.1754944e-38, %v1503_v24  ;;  %vm1502_vm15 = vcmp.eq.f32.partialorder %v1501_v34, 8.507059e+37 }
 0x211   : > { %v1327_v37 = vadd.f32 %v2941_v15, %v1326_v6  ;;  %v1480_v11 = vmul.f32 %v2370_v21, %v1479_v13 }
 0x213   : > { %v2372_v39 = vpop.eup %2371  ;;  %v2223_v0 = vmul.f32 -1.442695, %v1327_v37  ;;  %v1481_v48 = vadd.f32 %v2370_v21, %v1480_v11 }
 0x214   : > { %v2374_v52 = vpop.eup %2373  ;;  %v1407_v7 = vadd.f32 1.0, %v2372_v39 }
 0x215   : > { %2375 = vpow2.f32 %v2223_v0  ;;  %v1485_v32 = vsel %vm1484_vm10, %v2370_v21, %v1481_v48  ;;  %v1493_v28 = vmul.f32 %v2374_v52, %v1406_v17  ;;  %vm1498_vm12 = vweird.f32 %v2374_v52 }
 0x216   : > { %2377 = vrcp.f32 %v1407_v7  ;;  %v1490_v50 = vsel %vm1487_vm11, %v1489_v3, %v1485_v32  ;;  %vm1499_vm14 = vmor %vm1497_vm13, %vm1498_vm12  ;;  %v1518_v2 = vand.u32 2147483648, %v1407_v7  ;;  %v1516_v42 = vand.u32 2147483647, %v1407_v7 }
 0x217   : > { %2237 = vmatmul.msk.f32.gmra.mxu0 %vm1235_vm5, %v1490_v50  ;;  %v1494_v54 = vsub.f32 1.0, %v1493_v28  ;;  %vm1512_vm1 = vweird.f32 %v1407_v7 }
 0x218   : > { %v1329_v55 = vpop.f32.mrf.mxu3  ;;  %v1519_v26 = vor.u32 1.1754944e-38, %v1518_v2  ;;  %vm1517_vm3 = vcmp.eq.f32.partialorder %v1516_v42, 8.507059e+37 }
 0x219   : > { %v1330_v51 = vadd.f32 %v2941_v15, %v1329_v55  ;;  %v1495_v56 = vmul.f32 %v2374_v52, %v1494_v54 }
 0x21b   : > { %v2376_v35 = vpop.eup %2375  ;;  %v2224_v58 = vmul.f32 -1.442695, %v1330_v51  ;;  %v1496_v12 = vadd.f32 %v2374_v52, %v1495_v56 }
 0x21c   : > { %v2378_v30 = vpop.eup %2377  ;;  %v1408_v46 = vadd.f32 1.0, %v2376_v35 }
 0x21d   : > { %2379 = vpow2.f32 %v2224_v58  ;;  %v1500_v40 = vsel %vm1499_vm14, %v2374_v52, %v1496_v12  ;;  %v1508_v44 = vmul.f32 %v2378_v30, %v1407_v7  ;;  %vm1513_vm0 = vweird.f32 %v2378_v30 }
 0x21e   : > { %2381 = vrcp.f32 %v1408_v46  ;;  %v1505_v53 = vsel %vm1502_vm15, %v1504_v29, %v1500_v40  ;;  %vm1514_vm2 = vmor %vm1512_vm1, %vm1513_vm0  ;;  %v1533_v61 = vand.u32 2147483648, %v1408_v46  ;;  %v1531_v27 = vand.u32 2147483647, %v1408_v46 }
 0x21f   : > { %2238 = vmatmul.msk.f32.gmra.mxu0 %vm1235_vm5, %v1505_v53  ;;  %v1509_v1 = vsub.f32 1.0, %v1508_v44  ;;  %vm1527_vm6 = vweird.f32 %v1408_v46 }
 0x220   : > { %v1332_v59 = vpop.f32.mrf.mxu3  ;;  %v1534_v31 = vor.u32 1.1754944e-38, %v1533_v61  ;;  %vm1532_vm8 = vcmp.eq.f32.partialorder %v1531_v27, 8.507059e+37 }
 0x221   : > { %v1333_v4 = vadd.f32 %v2941_v15, %v1332_v59  ;;  %v1510_v10 = vmul.f32 %v2378_v30, %v1509_v1 }
 0x223   : > { %v2380_v45 = vpop.eup %2379  ;;  %v2225_v8 = vmul.f32 -1.442695, %v1333_v4  ;;  %v1511_v14 = vadd.f32 %v2378_v30, %v1510_v10 }
 0x224   : > { %v2382_v60 = vpop.eup %2381  ;;  %v1409_v62 = vadd.f32 1.0, %v2380_v45 }
 0x225   : > { %2383 = vpow2.f32 %v2225_v8  ;;  %v1515_v16 = vsel %vm1514_vm2, %v2378_v30, %v1511_v14  ;;  %v1523_v47 = vmul.f32 %v2382_v60, %v1408_v46  ;;  %vm1528_vm4 = vweird.f32 %v2382_v60 }
 0x226   : > { %2385 = vrcp.f32 %v1409_v62  ;;  %v1520_v63 = vsel %vm1517_vm3, %v1519_v26, %v1515_v16  ;;  %vm1529_vm7 = vmor %vm1527_vm6, %vm1528_vm4  ;;  %v1548_v5 = vand.u32 2147483648, %v1409_v62  ;;  %v1546_v23 = vand.u32 2147483647, %v1409_v62 }
 0x227   : > { %2239 = vmatmul.msk.f32.gmra.mxu0 %vm1235_vm5, %v1520_v63  ;;  %v1524_v49 = vsub.f32 1.0, %v1523_v47  ;;  %vm1542_vm10 = vweird.f32 %v1409_v62 }
 0x228   : > { %v1335_v18 = vpop.f32.mrf.mxu3  ;;  %v1549_v48 = vor.u32 1.1754944e-38, %v1548_v5  ;;  %vm1547_vm12 = vcmp.eq.f32.partialorder %v1546_v23, 8.507059e+37 }
 0x229   : > { %v1336_v20 = vadd.f32 %v2941_v15, %v1335_v18  ;;  %v1525_v25 = vmul.f32 %v2382_v60, %v1524_v49 }
 0x22b   : > { %v2384_v57 = vpop.eup %2383  ;;  %v2226_v19 = vmul.f32 -1.442695, %v1336_v20  ;;  %v1526_v43 = vadd.f32 %v2382_v60, %v1525_v25 }
 0x22c   : > { %v2386_v36 = vpop.eup %2385  ;;  %v1410_v41 = vadd.f32 1.0, %v2384_v57 }
 0x22d   : > { %2387 = vpow2.f32 %v2226_v19  ;;  %v1530_v21 = vsel %vm1529_vm7, %v2382_v60, %v1526_v43  ;;  %v1538_v17 = vmul.f32 %v2386_v36, %v1409_v62  ;;  %vm1543_vm9 = vweird.f32 %v2386_v36 }
 0x22e   : > { %2389 = vrcp.f32 %v1410_v41  ;;  %v1535_v9 = vsel %vm1532_vm8, %v1534_v31, %v1530_v21  ;;  %vm1544_vm11 = vmor %vm1542_vm10, %vm1543_vm9  ;;  %v1563_v50 = vand.u32 2147483648, %v1410_v41  ;;  %v1561_v24 = vand.u32 2147483647, %v1410_v41 }
 0x22f   : > { %2240 = vmatmul.msk.f32.gmra.mxu0 %vm1235_vm5, %v1535_v9  ;;  %v1539_v38 = vsub.f32 1.0, %v1538_v17  ;;  %vm1557_vm14 = vweird.f32 %v1410_v41 }
 0x230   : > { %v1338_v33 = vpop.f32.mrf.mxu3  ;;  %v1564_v12 = vor.u32 1.1754944e-38, %v1563_v50  ;;  %vm1562_vm0 = vcmp.eq.f32.partialorder %v1561_v24, 8.507059e+37 }
 0x231   : > { %v1339_v13 = vadd.f32 %v2941_v15, %v1338_v33  ;;  %v1540_v6 = vmul.f32 %v2386_v36, %v1539_v38 }
 0x233   : > { %v2388_v37 = vpop.eup %2387  ;;  %v2227_v11 = vmul.f32 -1.442695, %v1339_v13  ;;  %v1541_v22 = vadd.f32 %v2386_v36, %v1540_v6 }
 0x234   : > { %v2390_v39 = vpop.eup %2389  ;;  %v1411_v0 = vadd.f32 1.0, %v2388_v37 }
 0x235   : > { %2391 = vpow2.f32 %v2227_v11  ;;  %v1545_v52 = vsel %vm1544_vm11, %v2386_v36, %v1541_v22  ;;  %v1553_v7 = vmul.f32 %v2390_v39, %v1410_v41  ;;  %vm1558_vm13 = vweird.f32 %v2390_v39 }
 0x236   : > { %2393 = vrcp.f32 %v1411_v0  ;;  %v1550_v3 = vsel %vm1547_vm12, %v1549_v48, %v1545_v52  ;;  %vm1559_vm15 = vmor %vm1557_vm14, %vm1558_vm13  ;;  %v1578_v53 = vand.u32 2147483648, %v1411_v0  ;;  %v1576_v2 = vand.u32 2147483647, %v1411_v0 }
 0x237   : > { %2241 = vmatmul.msk.f32.gmra.mxu0 %vm1235_vm5, %v1550_v3  ;;  %v1554_v32 = vsub.f32 1.0, %v1553_v7  ;;  %vm1572_vm2 = vweird.f32 %v1411_v0 }
 0x238   : > { %v1341_v28 = vpop.f32.mrf.mxu3  ;;  %v1579_v14 = vor.u32 1.1754944e-38, %v1578_v53  ;;  %vm1577_vm4 = vcmp.eq.f32.partialorder %v1576_v2, 8.507059e+37 }
 0x239   : > { %v1342_v54 = vadd.f32 %v2941_v15, %v1341_v28  ;;  %v1555_v55 = vmul.f32 %v2390_v39, %v1554_v32 }
 0x23b   : > { %v2392_v51 = vpop.eup %2391  ;;  %v2228_v56 = vmul.f32 -1.442695, %v1342_v54  ;;  %v1556_v34 = vadd.f32 %v2390_v39, %v1555_v55 }
 0x23c   : > { %v2394_v35 = vpop.eup %2393  ;;  %v1412_v58 = vadd.f32 1.0, %v2392_v51 }
 0x23d   : > { %2395 = vpow2.f32 %v2228_v56  ;;  %v1560_v30 = vsel %vm1559_vm15, %v2390_v39, %v1556_v34  ;;  %v1568_v46 = vmul.f32 %v2394_v35, %v1411_v0  ;;  %vm1573_vm1 = vweird.f32 %v2394_v35 }
 0x23e   : > { %2397 = vrcp.f32 %v1412_v58  ;;  %v1565_v29 = vsel %vm1562_vm0, %v1564_v12, %v1560_v30  ;;  %vm1574_vm3 = vmor %vm1572_vm2, %vm1573_vm1  ;;  %v1593_v63 = vand.u32 2147483648, %v1412_v58  ;;  %v1591_v61 = vand.u32 2147483647, %v1412_v58 }
 0x23f   : > { %2242 = vmatmul.msk.f32.gmra.mxu0 %vm1235_vm5, %v1565_v29  ;;  %v1569_v40 = vsub.f32 1.0, %v1568_v46  ;;  %vm1587_vm7 = vweird.f32 %v1412_v58 }
 0x240   : > { %v1344_v44 = vpop.f32.mrf.mxu3  ;;  %v1594_v43 = vor.u32 1.1754944e-38, %v1593_v63  ;;  %vm1592_vm9 = vcmp.eq.f32.partialorder %v1591_v61, 8.507059e+37 }
 0x241   : > { %v1345_v1 = vadd.f32 %v2941_v15, %v1344_v44  ;;  %v1570_v59 = vmul.f32 %v2394_v35, %v1569_v40 }
 0x243   : > { %v2396_v4 = vpop.eup %2395  ;;  %v2229_v10 = vmul.f32 -1.442695, %v1345_v1  ;;  %v1571_v42 = vadd.f32 %v2394_v35, %v1570_v59 }
 0x244   : > { %v2398_v45 = vpop.eup %2397  ;;  %v1413_v8 = vadd.f32 1.0, %v2396_v4 }
 0x245   : > { %2399 = vpow2.f32 %v2229_v10  ;;  %v1575_v60 = vsel %vm1574_vm3, %v2394_v35, %v1571_v42  ;;  %v1583_v62 = vmul.f32 %v2398_v45, %v1412_v58  ;;  %vm1588_vm6 = vweird.f32 %v2398_v45 }
 0x246   : > { %2401 = vrcp.f32 %v1413_v8  ;;  %v1580_v26 = vsel %vm1577_vm4, %v1579_v14, %v1575_v60  ;;  %vm1589_vm8 = vmor %vm1587_vm7, %vm1588_vm6  ;;  %v1608_v9 = vand.u32 2147483648, %v1413_v8  ;;  %v1606_v5 = vand.u32 2147483647, %v1413_v8  ;;  %v2978_v14 = vld [vmem:[%s3043_s6] ss:$0 sm:$0xff] }
 0x247   : > { %2243 = vmatmul.msk.f32.gmra.mxu0 %vm1235_vm5, %v1580_v26  ;;  %v1584_v16 = vsub.f32 1.0, %v1583_v62  ;;  %vm1602_vm11 = vweird.f32 %v1413_v8 }
 0x248   : > { %v1347_v47 = vpop.f32.mrf.mxu3  ;;  %v1609_v22 = vor.u32 1.1754944e-38, %v1608_v9  ;;  %vm1607_vm13 = vcmp.eq.f32.partialorder %v1606_v5, 8.507059e+37 }
 0x249   : > { %v1348_v49 = vadd.f32 %v2941_v15, %v1347_v47  ;;  %v1585_v18 = vmul.f32 %v2398_v45, %v1584_v16 }
 0x24b   : > { %v2400_v20 = vpop.eup %2399  ;;  %v2230_v25 = vmul.f32 -1.442695, %v1348_v49  ;;  %v1586_v27 = vadd.f32 %v2398_v45, %v1585_v18 }
 0x24c   : > { %v2402_v57 = vpop.eup %2401  ;;  %v1414_v19 = vadd.f32 1.0, %v2400_v20 }
 0x24d   : > { %2403 = vpow2.f32 %v2230_v25  ;;  %v1590_v36 = vsel %vm1589_vm8, %v2398_v45, %v1586_v27  ;;  %v1598_v41 = vmul.f32 %v2402_v57, %v1413_v8  ;;  %vm1603_vm10 = vweird.f32 %v2402_v57 }
 0x24e   : > { %2405 = vrcp.f32 %v1414_v19  ;;  %v1595_v31 = vsel %vm1592_vm9, %v1594_v43, %v1590_v36  ;;  %vm1604_vm12 = vmor %vm1602_vm11, %vm1603_vm10  ;;  %v1623_v52 = vand.u32 2147483648, %v1414_v19  ;;  %v1621_v3 = vand.u32 2147483647, %v1414_v19 }
 0x24f   : > { %2244 = vmatmul.msk.f32.gmra.mxu0 %vm1235_vm5, %v1595_v31  ;;  %v1599_v21 = vsub.f32 1.0, %v1598_v41  ;;  %vm1617_vm15 = vweird.f32 %v1414_v19 }
 0x250   : > { %v1350_v17 = vpop.f32.mrf.mxu3  ;;  %v1624_v55 = vor.u32 1.1754944e-38, %v1623_v52  ;;  %vm1622_vm1 = vcmp.eq.f32.partialorder %v1621_v3, 8.507059e+37 }
 0x251   : > { %v1351_v38 = vadd.f32 %v2941_v15, %v1350_v17  ;;  %v1600_v33 = vmul.f32 %v2402_v57, %v1599_v21 }
 0x253   : > { %v2404_v13 = vpop.eup %2403  ;;  %v2231_v6 = vmul.f32 -1.442695, %v1351_v38  ;;  %v1601_v23 = vadd.f32 %v2402_v57, %v1600_v33 }
 0x254   : > { %v2406_v37 = vpop.eup %2405  ;;  %v1415_v11 = vadd.f32 1.0, %v2404_v13 }
 0x255   : > { %2407 = vpow2.f32 %v2231_v6  ;;  %v1605_v39 = vsel %vm1604_vm12, %v2402_v57, %v1601_v23  ;;  %v1613_v0 = vmul.f32 %v2406_v37, %v1414_v19  ;;  %vm1618_vm14 = vweird.f32 %v2406_v37 }
 0x256   : > { %2409 = vrcp.f32 %v1415_v11  ;;  %v1610_v48 = vsel %vm1607_vm13, %v1609_v22, %v1605_v39  ;;  %vm1619_vm0 = vmor %vm1617_vm15, %vm1618_vm14  ;;  %v1638_v35 = vand.u32 2147483648, %v1415_v11  ;;  %v1636_v12 = vand.u32 2147483647, %v1415_v11 }
 0x257   : > { %2245 = vmatmul.msk.f32.gmra.mxu0 %vm1235_vm5, %v1610_v48  ;;  %v1614_v15 = vsub.f32 1.0, %v1613_v0  ;;  %vm1632_vm3 = vweird.f32 %v1415_v11  ;;  %vm2083_vm13 = vcmask 31744  }
 0x258   : > { %v1639_v29 = vor.u32 1.1754944e-38, %v1638_v35  ;;  %vm1637_vm6 = vcmp.eq.f32.partialorder %v1636_v12, 8.507059e+37 }
 0x259   : > { %v1615_v7 = vmul.f32 %v2406_v37, %v1614_v15 }
 0x25b   : > { %v2408_v32 = vpop.eup %2407  ;;  %v1616_v28 = vadd.f32 %v2406_v37, %v1615_v7 }
 0x25c   : > { %v2410_v50 = vpop.eup %2409  ;;  %v1416_v54 = vadd.f32 1.0, %v2408_v32 }
 0x25d   : > { %v1620_v24 = vsel %vm1619_vm0, %v2406_v37, %v1616_v28  ;;  %v1628_v51 = vmul.f32 %v2410_v50, %v1415_v11  ;;  %vm1633_vm2 = vweird.f32 %v2410_v50 }
 0x25e   : > { %2411 = vrcp.f32 %v1416_v54  ;;  %v1625_v56 = vsel %vm1622_vm1, %v1624_v55, %v1620_v24  ;;  %vm1634_vm4 = vmor %vm1632_vm3, %vm1633_vm2  ;;  %v1653_v59 = vand.u32 2147483648, %v1416_v54  ;;  %v1651_v4 = vand.u32 2147483647, %v1416_v54 }
 0x25f   : > { %2246 = vmatmul.msk.f32.gmra.mxu0 %vm1235_vm5, %v1625_v56  ;;  %v1629_v34 = vsub.f32 1.0, %v1628_v51  ;;  %vm1647_vm8 = vweird.f32 %v1416_v54 }
 0x260   : > { %v1654_v42 = vor.u32 1.1754944e-38, %v1653_v59  ;;  %vm1652_vm10 = vcmp.eq.f32.partialorder %v1651_v4, 8.507059e+37 }
 0x261   : > { %v1630_v58 = vmul.f32 %v2410_v50, %v1629_v34 }
 0x263   : > { %v1631_v30 = vadd.f32 %v2410_v50, %v1630_v58 }
 0x264   : > { %v2412_v46 = vpop.eup %2411 }
 0x265   : > { %v1635_v40 = vsel %vm1634_vm4, %v2410_v50, %v1631_v30  ;;  %v1643_v44 = vmul.f32 %v2412_v46, %v1416_v54  ;;  %vm1648_vm7 = vweird.f32 %v2412_v46 }
 0x266   : > { %v1640_v53 = vsel %vm1637_vm6, %v1639_v29, %v1635_v40  ;;  %vm1649_vm9 = vmor %vm1647_vm8, %vm1648_vm7 }
 0x267   : > { %2247 = vmatmul.msk.f32.gmra.mxu0 %vm1235_vm5, %v1640_v53  ;;  %v1644_v1 = vsub.f32 1.0, %v1643_v44 }
 0x269   : > { %v1645_v2 = vmul.f32 %v2412_v46, %v1644_v1 }
 0x26b   : > { %v1646_v10 = vadd.f32 %v2412_v46, %v1645_v2 }
 0x26d   : > { %v1650_v45 = vsel %vm1649_vm9, %v2412_v46, %v1646_v10 }
 0x26e   : > { %v1655_v8 = vsel %vm1652_vm10, %v1654_v42, %v1650_v45 }
 0x26f   : > { %2248 = vmatmul.msk.f32.gmra.mxu0 %vm1235_vm5, %v1655_v8 }
 0x274   : > { %v1731_v60 = vpop.f32.mrf.mxu0 }
 0x275   : > { %v1732_v62 = vadd.f32 %v2978_v14, %v1731_v60 }
 0x277   : > { %v2249_v26 = vmul.f32 -1.442695, %v1732_v62 }
 0x279   : > { %2413 = vpow2.f32 %v2249_v26 }
 0x27c   : > { %v1734_v16 = vpop.f32.mrf.mxu0 }
 0x27d   : > { %v1735_v47 = vadd.f32 %v2978_v14, %v1734_v16 }
 0x27f   : > { %v2414_v63 = vpop.eup %2413  ;;  %v2250_v49 = vmul.f32 -1.442695, %v1735_v47 }
 0x280   : > { %v1827_v18 = vadd.f32 1.0, %v2414_v63 }
 0x281   : > { %2415 = vpow2.f32 %v2250_v49 }
 0x282   : > { %2417 = vrcp.f32 %v1827_v18  ;;  %v1854_v41 = vand.u32 2147483648, %v1827_v18  ;;  %v1852_v17 = vand.u32 2147483647, %v1827_v18  ;;  %vm1848_vm11 = vweird.f32 %v1827_v18 }
 0x284   : > { %v1737_v61 = vpop.f32.mrf.mxu0  ;;  %v1855_v6 = vor.u32 1.1754944e-38, %v1854_v41  ;;  %vm1853_vm14 = vcmp.eq.f32.partialorder %v1852_v17, 8.507059e+37 }
 0x285   : > { %v1738_v20 = vadd.f32 %v2978_v14, %v1737_v61 }
 0x287   : > { %v2416_v25 = vpop.eup %2415  ;;  %v2251_v27 = vmul.f32 -1.442695, %v1738_v20 }
 0x288   : > { %v2418_v57 = vpop.eup %2417  ;;  %v1828_v19 = vadd.f32 1.0, %v2416_v25 }
 0x289   : > { %v1844_v43 = vmul.f32 %v2418_v57, %v1827_v18  ;;  %2419 = vpow2.f32 %v2251_v27  ;;  %vm1849_vm5 = vweird.f32 %v2418_v57 }
 0x28a   : > { %2421 = vrcp.f32 %v1828_v19  ;;  %vm1850_vm12 = vmor %vm1848_vm11, %vm1849_vm5  ;;  %v1869_v0 = vand.u32 2147483648, %v1828_v19  ;;  %v1867_v52 = vand.u32 2147483647, %v1828_v19  ;;  %vm1863_vm0 = vweird.f32 %v1828_v19 }
 0x28b   : > { %v1845_v36 = vsub.f32 1.0, %v1844_v43 }
 0x28c   : > { %v1740_v31 = vpop.f32.mrf.mxu0  ;;  %v1870_v54 = vor.u32 1.1754944e-38, %v1869_v0  ;;  %vm1868_vm2 = vcmp.eq.f32.partialorder %v1867_v52, 8.507059e+37 }
 0x28d   : > { %v1846_v21 = vmul.f32 %v2418_v57, %v1845_v36  ;;  %v1741_v9 = vadd.f32 %v2978_v14, %v1740_v31 }
 0x28f   : > { %v2420_v38 = vpop.eup %2419  ;;  %v1847_v33 = vadd.f32 %v2418_v57, %v1846_v21  ;;  %v2252_v5 = vmul.f32 -1.442695, %v1741_v9 }
 0x290   : > { %v2422_v13 = vpop.eup %2421  ;;  %v1829_v23 = vadd.f32 1.0, %v2420_v38 }
 0x291   : > { %v1851_v37 = vsel %vm1850_vm12, %v2418_v57, %v1847_v33  ;;  %v1859_v11 = vmul.f32 %v2422_v13, %v1828_v19  ;;  %2423 = vpow2.f32 %v2252_v5  ;;  %vm1864_vm15 = vweird.f32 %v2422_v13 }
 0x292   : > { %v1856_v22 = vsel %vm1853_vm14, %v1855_v6, %v1851_v37  ;;  %2425 = vrcp.f32 %v1829_v23  ;;  %vm1865_vm1 = vmor %vm1863_vm0, %vm1864_vm15  ;;  %v1884_v35 = vand.u32 2147483648, %v1829_v23  ;;  %v1882_v30 = vand.u32 2147483647, %v1829_v23 }
 0x293   : > { %2084 = vst.msk [vmem:[%s2988_s11] sm:$0xff] %vm2083_vm13, %v1856_v22  ;;  %v1860_v39 = vsub.f32 1.0, %v1859_v11  ;;  %vm1878_vm4 = vweird.f32 %v1829_v23 }
 0x294   : > { %v1743_v48 = vpop.f32.mrf.mxu0  ;;  %v1885_v1 = vor.u32 1.1754944e-38, %v1884_v35  ;;  %vm1883_vm7 = vcmp.eq.f32.partialorder %v1882_v30, 8.507059e+37 }
 0x295   : > { %v1861_v15 = vmul.f32 %v2422_v13, %v1860_v39  ;;  %v1744_v7 = vadd.f32 %v2978_v14, %v1743_v48 }
 0x297   : > { %v2424_v3 = vpop.eup %2423  ;;  %v1862_v32 = vadd.f32 %v2422_v13, %v1861_v15  ;;  %v2253_v28 = vmul.f32 -1.442695, %v1744_v7 }
 0x298   : > { %v2426_v50 = vpop.eup %2425  ;;  %v1830_v55 = vadd.f32 1.0, %v2424_v3 }
 0x299   : > { %v1866_v24 = vsel %vm1865_vm1, %v2422_v13, %v1862_v32  ;;  %v1874_v51 = vmul.f32 %v2426_v50, %v1829_v23  ;;  %2427 = vpow2.f32 %v2253_v28  ;;  %vm1879_vm3 = vweird.f32 %v2426_v50 }
 0x29a   : > { %v1871_v56 = vsel %vm1868_vm2, %v1870_v54, %v1866_v24  ;;  %2429 = vrcp.f32 %v1830_v55  ;;  %vm1880_vm6 = vmor %vm1878_vm4, %vm1879_vm3  ;;  %v1899_v45 = vand.u32 2147483648, %v1830_v55  ;;  %v1897_v62 = vand.u32 2147483647, %v1830_v55 }
 0x29b   : > { %2085 = vst.msk [vmem:[%s2988_s11 + $0x8] sm:$0xff] %vm2083_vm13, %v1871_v56  ;;  %v1875_v34 = vsub.f32 1.0, %v1874_v51  ;;  %vm1893_vm9 = vweird.f32 %v1830_v55 }
 0x29c   : > { %v1746_v58 = vpop.f32.mrf.mxu0  ;;  %v1900_v18 = vor.u32 1.1754944e-38, %v1899_v45  ;;  %vm1898_vm5 = vcmp.eq.f32.partialorder %v1897_v62, 8.507059e+37 }
 0x29d   : > { %v1876_v12 = vmul.f32 %v2426_v50, %v1875_v34  ;;  %v1747_v46 = vadd.f32 %v2978_v14, %v1746_v58 }
 0x29f   : > { %v2428_v29 = vpop.eup %2427  ;;  %v1877_v40 = vadd.f32 %v2426_v50, %v1876_v12  ;;  %v2254_v44 = vmul.f32 -1.442695, %v1747_v46 }
 0x2a0   : > { %v2430_v53 = vpop.eup %2429  ;;  %v1831_v59 = vadd.f32 1.0, %v2428_v29 }
 0x2a1   : > { %v1881_v2 = vsel %vm1880_vm6, %v2426_v50, %v1877_v40  ;;  %v1889_v4 = vmul.f32 %v2430_v53, %v1830_v55  ;;  %2431 = vpow2.f32 %v2254_v44  ;;  %vm1894_vm8 = vweird.f32 %v2430_v53 }
 0x2a2   : > { %v1886_v10 = vsel %vm1883_vm7, %v1885_v1, %v1881_v2  ;;  %2433 = vrcp.f32 %v1831_v59  ;;  %vm1895_vm10 = vmor %vm1893_vm9, %vm1894_vm8  ;;  %v1914_v19 = vand.u32 2147483648, %v1831_v59  ;;  %v1912_v41 = vand.u32 2147483647, %v1831_v59 }
 0x2a3   : > { %2086 = vst.msk [vmem:[%s2988_s11 + $0x10] sm:$0xff] %vm2083_vm13, %v1886_v10  ;;  %v1890_v42 = vsub.f32 1.0, %v1889_v4  ;;  %vm1908_vm12 = vweird.f32 %v1831_v59 }
 0x2a4   : > { %v1749_v8 = vpop.f32.mrf.mxu0  ;;  %v1915_v33 = vor.u32 1.1754944e-38, %v1914_v19  ;;  %vm1913_vm15 = vcmp.eq.f32.partialorder %v1912_v41, 8.507059e+37 }
 0x2a5   : > { %v1891_v60 = vmul.f32 %v2430_v53, %v1890_v42  ;;  %v1750_v26 = vadd.f32 %v2978_v14, %v1749_v8 }
 0x2a7   : > { %v2432_v16 = vpop.eup %2431  ;;  %v1892_v47 = vadd.f32 %v2430_v53, %v1891_v60  ;;  %v2255_v63 = vmul.f32 -1.442695, %v1750_v26 }
 0x2a8   : > { %v2434_v49 = vpop.eup %2433  ;;  %v1832_v61 = vadd.f32 1.0, %v2432_v16 }
 0x2a9   : > { %v1896_v20 = vsel %vm1895_vm10, %v2430_v53, %v1892_v47  ;;  %v1904_v25 = vmul.f32 %v2434_v49, %v1831_v59  ;;  %2435 = vpow2.f32 %v2255_v63  ;;  %vm1909_vm11 = vweird.f32 %v2434_v49 }
 0x2aa   : > { %v1901_v27 = vsel %vm1898_vm5, %v1900_v18, %v1896_v20  ;;  %2437 = vrcp.f32 %v1832_v61  ;;  %vm1910_vm14 = vmor %vm1908_vm12, %vm1909_vm11  ;;  %v1929_v11 = vand.u32 2147483648, %v1832_v61  ;;  %v1927_v0 = vand.u32 2147483647, %v1832_v61 }
 0x2ab   : > { %2087 = vst.msk [vmem:[%s2988_s11 + $0x18] sm:$0xff] %vm2083_vm13, %v1901_v27  ;;  %v1905_v57 = vsub.f32 1.0, %v1904_v25  ;;  %vm1923_vm1 = vweird.f32 %v1832_v61 }
 0x2ac   : > { %v1752_v43 = vpop.f32.mrf.mxu0  ;;  %v1930_v32 = vor.u32 1.1754944e-38, %v1929_v11  ;;  %vm1928_vm3 = vcmp.eq.f32.partialorder %v1927_v0, 8.507059e+37 }
 0x2ad   : > { %v1906_v36 = vmul.f32 %v2434_v49, %v1905_v57  ;;  %v1753_v31 = vadd.f32 %v2978_v14, %v1752_v43 }
 0x2af   : > { %v2436_v21 = vpop.eup %2435  ;;  %v1907_v17 = vadd.f32 %v2434_v49, %v1906_v36  ;;  %v2256_v9 = vmul.f32 -1.442695, %v1753_v31 }
 0x2b0   : > { %v2438_v38 = vpop.eup %2437  ;;  %v1833_v5 = vadd.f32 1.0, %v2436_v21 }
 0x2b1   : > { %v1911_v13 = vsel %vm1910_vm14, %v2434_v49, %v1907_v17  ;;  %v1919_v6 = vmul.f32 %v2438_v38, %v1832_v61  ;;  %2439 = vpow2.f32 %v2256_v9  ;;  %vm1924_vm0 = vweird.f32 %v2438_v38 }
 0x2b2   : > { %v1916_v23 = vsel %vm1913_vm15, %v1915_v33, %v1911_v13  ;;  %2441 = vrcp.f32 %v1833_v5  ;;  %vm1925_vm2 = vmor %vm1923_vm1, %vm1924_vm0  ;;  %v1944_v51 = vand.u32 2147483648, %v1833_v5  ;;  %v1942_v35 = vand.u32 2147483647, %v1833_v5 }
 0x2b3   : > { %2088 = vst.msk [vmem:[%s2988_s11 + $0x20] sm:$0xff] %vm2083_vm13, %v1916_v23  ;;  %v1920_v37 = vsub.f32 1.0, %v1919_v6  ;;  %vm1938_vm6 = vweird.f32 %v1833_v5 }
 0x2b4   : > { %v1755_v22 = vpop.f32.mrf.mxu0  ;;  %v1945_v40 = vor.u32 1.1754944e-38, %v1944_v51  ;;  %vm1943_vm8 = vcmp.eq.f32.partialorder %v1942_v35, 8.507059e+37 }
 0x2b5   : > { %v1921_v39 = vmul.f32 %v2438_v38, %v1920_v37  ;;  %v1756_v48 = vadd.f32 %v2978_v14, %v1755_v22 }
 0x2b7   : > { %v2440_v15 = vpop.eup %2439  ;;  %v1922_v52 = vadd.f32 %v2438_v38, %v1921_v39  ;;  %v2257_v7 = vmul.f32 -1.442695, %v1756_v48 }
 0x2b8   : > { %v2442_v3 = vpop.eup %2441  ;;  %v1834_v28 = vadd.f32 1.0, %v2440_v15 }
 0x2b9   : > { %v1926_v50 = vsel %vm1925_vm2, %v2438_v38, %v1922_v52  ;;  %v1934_v54 = vmul.f32 %v2442_v3, %v1833_v5  ;;  %2443 = vpow2.f32 %v2257_v7  ;;  %vm1939_vm4 = vweird.f32 %v2442_v3 }
 0x2ba   : > { %v1931_v55 = vsel %vm1928_vm3, %v1930_v32, %v1926_v50  ;;  %2445 = vrcp.f32 %v1834_v28  ;;  %vm1940_vm7 = vmor %vm1938_vm6, %vm1939_vm4  ;;  %v1959_v4 = vand.u32 2147483648, %v1834_v28  ;;  %v1957_v45 = vand.u32 2147483647, %v1834_v28 }
 0x2bb   : > { %2089 = vst.msk [vmem:[%s2988_s11 + $0x28] sm:$0xff] %vm2083_vm13, %v1931_v55  ;;  %v1935_v24 = vsub.f32 1.0, %v1934_v54  ;;  %vm1953_vm10 = vweird.f32 %v1834_v28 }
 0x2bc   : > { %v1758_v56 = vpop.f32.mrf.mxu0  ;;  %v1960_v47 = vor.u32 1.1754944e-38, %v1959_v4  ;;  %vm1958_vm11 = vcmp.eq.f32.partialorder %v1957_v45, 8.507059e+37 }
 0x2bd   : > { %v1936_v34 = vmul.f32 %v2442_v3, %v1935_v24  ;;  %v1759_v58 = vadd.f32 %v2978_v14, %v1758_v56 }
 0x2bf   : > { %v2444_v12 = vpop.eup %2443  ;;  %v1937_v30 = vadd.f32 %v2442_v3, %v1936_v34  ;;  %v2258_v46 = vmul.f32 -1.442695, %v1759_v58 }
 0x2c0   : > { %v2446_v29 = vpop.eup %2445  ;;  %v1835_v44 = vadd.f32 1.0, %v2444_v12 }
 0x2c1   : > { %v1941_v53 = vsel %vm1940_vm7, %v2442_v3, %v1937_v30  ;;  %v1949_v1 = vmul.f32 %v2446_v29, %v1834_v28  ;;  %2447 = vpow2.f32 %v2258_v46  ;;  %vm1954_vm9 = vweird.f32 %v2446_v29 }
 0x2c2   : > { %v1946_v59 = vsel %vm1943_vm8, %v1945_v40, %v1941_v53  ;;  %2449 = vrcp.f32 %v1835_v44  ;;  %vm1955_vm5 = vmor %vm1953_vm10, %vm1954_vm9  ;;  %v1974_v25 = vand.u32 2147483648, %v1835_v44  ;;  %v1972_v19 = vand.u32 2147483647, %v1835_v44 }
 0x2c3   : > { %2090 = vst.msk [vmem:[%s2988_s11 + $0x30] sm:$0xff] %vm2083_vm13, %v1946_v59  ;;  %v1950_v2 = vsub.f32 1.0, %v1949_v1  ;;  %vm1968_vm14 = vweird.f32 %v1835_v44 }
 0x2c4   : > { %v1761_v10 = vpop.f32.mrf.mxu0  ;;  %v1975_v17 = vor.u32 1.1754944e-38, %v1974_v25  ;;  %vm1973_vm0 = vcmp.eq.f32.partialorder %v1972_v19, 8.507059e+37 }
 0x2c5   : > { %v1951_v42 = vmul.f32 %v2446_v29, %v1950_v2  ;;  %v1762_v8 = vadd.f32 %v2978_v14, %v1761_v10 }
 0x2c7   : > { %v2448_v60 = vpop.eup %2447  ;;  %v1952_v62 = vadd.f32 %v2446_v29, %v1951_v42  ;;  %v2259_v26 = vmul.f32 -1.442695, %v1762_v8 }
 0x2c8   : > { %v2450_v16 = vpop.eup %2449  ;;  %v1836_v63 = vadd.f32 1.0, %v2448_v60 }
 0x2c9   : > { %v1956_v49 = vsel %vm1955_vm5, %v2446_v29, %v1952_v62  ;;  %v1964_v18 = vmul.f32 %v2450_v16, %v1835_v44  ;;  %2451 = vpow2.f32 %v2259_v26  ;;  %vm1969_vm12 = vweird.f32 %v2450_v16 }
 0x2ca   : > { %v1961_v61 = vsel %vm1958_vm11, %v1960_v47, %v1956_v49  ;;  %2453 = vrcp.f32 %v1836_v63  ;;  %vm1970_vm15 = vmor %vm1968_vm14, %vm1969_vm12  ;;  %v1989_v6 = vand.u32 2147483648, %v1836_v63  ;;  %v1987_v11 = vand.u32 2147483647, %v1836_v63 }
 0x2cb   : > { %2091 = vst.msk [vmem:[%s2988_s11 + $0x38] sm:$0xff] %vm2083_vm13, %v1961_v61  ;;  %v1965_v20 = vsub.f32 1.0, %v1964_v18  ;;  %vm1983_vm2 = vweird.f32 %v1836_v63 }
 0x2cc   : > { %v1764_v27 = vpop.f32.mrf.mxu0  ;;  %v1990_v52 = vor.u32 1.1754944e-38, %v1989_v6  ;;  %vm1988_vm4 = vcmp.eq.f32.partialorder %v1987_v11, 8.507059e+37 }
 0x2cd   : > { %v1966_v57 = vmul.f32 %v2450_v16, %v1965_v20  ;;  %v1765_v43 = vadd.f32 %v2978_v14, %v1764_v27 }
 0x2cf   : > { %v2452_v36 = vpop.eup %2451  ;;  %v1967_v41 = vadd.f32 %v2450_v16, %v1966_v57  ;;  %v2260_v31 = vmul.f32 -1.442695, %v1765_v43 }
 0x2d0   : > { %v2454_v21 = vpop.eup %2453  ;;  %v1837_v9 = vadd.f32 1.0, %v2452_v36 }
 0x2d1   : > { %v1971_v38 = vsel %vm1970_vm15, %v2450_v16, %v1967_v41  ;;  %v1979_v33 = vmul.f32 %v2454_v21, %v1836_v63  ;;  %2455 = vpow2.f32 %v2260_v31  ;;  %vm1984_vm1 = vweird.f32 %v2454_v21 }
 0x2d2   : > { %v1976_v5 = vsel %vm1973_vm0, %v1975_v17, %v1971_v38  ;;  %2457 = vrcp.f32 %v1837_v9  ;;  %vm1985_vm3 = vmor %vm1983_vm2, %vm1984_vm1  ;;  %v2004_v54 = vand.u32 2147483648, %v1837_v9  ;;  %v2002_v51 = vand.u32 2147483647, %v1837_v9 }
 0x2d3   : > { %2092 = vst.msk [vmem:[%s2988_s11 + $0x40] sm:$0xff] %vm2083_vm13, %v1976_v5  ;;  %v1980_v13 = vsub.f32 1.0, %v1979_v33  ;;  %vm1998_vm7 = vweird.f32 %v1837_v9 }
 0x2d4   : > { %v1767_v23 = vpop.f32.mrf.mxu0  ;;  %v2005_v30 = vor.u32 1.1754944e-38, %v2004_v54  ;;  %vm2003_vm9 = vcmp.eq.f32.partialorder %v2002_v51, 8.507059e+37 }
 0x2d5   : > { %v1981_v37 = vmul.f32 %v2454_v21, %v1980_v13  ;;  %v1768_v22 = vadd.f32 %v2978_v14, %v1767_v23 }
 0x2d7   : > { %v2456_v39 = vpop.eup %2455  ;;  %v1982_v0 = vadd.f32 %v2454_v21, %v1981_v37  ;;  %v2261_v48 = vmul.f32 -1.442695, %v1768_v22 }
 0x2d8   : > { %v2458_v15 = vpop.eup %2457  ;;  %v1838_v7 = vadd.f32 1.0, %v2456_v39 }
 0x2d9   : > { %v1986_v3 = vsel %vm1985_vm3, %v2454_v21, %v1982_v0  ;;  %v1994_v32 = vmul.f32 %v2458_v15, %v1837_v9  ;;  %2459 = vpow2.f32 %v2261_v48  ;;  %vm1999_vm6 = vweird.f32 %v2458_v15 }
 0x2da   : > { %v1991_v28 = vsel %vm1988_vm4, %v1990_v52, %v1986_v3  ;;  %2461 = vrcp.f32 %v1838_v7  ;;  %vm2000_vm8 = vmor %vm1998_vm7, %vm1999_vm6  ;;  %v2019_v1 = vand.u32 2147483648, %v1838_v7  ;;  %v2017_v4 = vand.u32 2147483647, %v1838_v7 }
 0x2db   : > { %2093 = vst.msk [vmem:[%s2988_s11 + $0x48] sm:$0xff] %vm2083_vm13, %v1991_v28  ;;  %v1995_v50 = vsub.f32 1.0, %v1994_v32  ;;  %vm2013_vm5 = vweird.f32 %v1838_v7 }
 0x2dc   : > { %v1770_v55 = vpop.f32.mrf.mxu0  ;;  %v2020_v62 = vor.u32 1.1754944e-38, %v2019_v1  ;;  %vm2018_vm12 = vcmp.eq.f32.partialorder %v2017_v4, 8.507059e+37 }
 0x2dd   : > { %v1996_v24 = vmul.f32 %v2458_v15, %v1995_v50  ;;  %v1771_v56 = vadd.f32 %v2978_v14, %v1770_v55 }
 0x2df   : > { %v2460_v34 = vpop.eup %2459  ;;  %v1997_v35 = vadd.f32 %v2458_v15, %v1996_v24  ;;  %v2262_v58 = vmul.f32 -1.442695, %v1771_v56 }
 0x2e0   : > { %v2462_v12 = vpop.eup %2461  ;;  %v1839_v46 = vadd.f32 1.0, %v2460_v34 }
 0x2e1   : > { %v2001_v29 = vsel %vm2000_vm8, %v2458_v15, %v1997_v35  ;;  %v2009_v40 = vmul.f32 %v2462_v12, %v1838_v7  ;;  %2463 = vpow2.f32 %v2262_v58  ;;  %vm2014_vm10 = vweird.f32 %v2462_v12 }
 0x2e2   : > { %v2006_v44 = vsel %vm2003_vm9, %v2005_v30, %v2001_v29  ;;  %2465 = vrcp.f32 %v1839_v46  ;;  %vm2015_vm11 = vmor %vm2013_vm5, %vm2014_vm10  ;;  %v2034_v18 = vand.u32 2147483648, %v1839_v46  ;;  %v2032_v25 = vand.u32 2147483647, %v1839_v46 }
 0x2e3   : > { %2094 = vst.msk [vmem:[%s2988_s11 + $0x50] sm:$0xff] %vm2083_vm13, %v2006_v44  ;;  %v2010_v53 = vsub.f32 1.0, %v2009_v40  ;;  %vm2028_vm15 = vweird.f32 %v1839_v46 }
 0x2e4   : > { %v1773_v59 = vpop.f32.mrf.mxu0  ;;  %v2035_v41 = vor.u32 1.1754944e-38, %v2034_v18  ;;  %vm2033_vm1 = vcmp.eq.f32.partialorder %v2032_v25, 8.507059e+37 }
 0x2e5   : > { %v2011_v2 = vmul.f32 %v2462_v12, %v2010_v53  ;;  %v1774_v10 = vadd.f32 %v2978_v14, %v1773_v59 }
 0x2e7   : > { %v2464_v42 = vpop.eup %2463  ;;  %v2012_v45 = vadd.f32 %v2462_v12, %v2011_v2  ;;  %v2263_v8 = vmul.f32 -1.442695, %v1774_v10 }
 0x2e8   : > { %v2466_v60 = vpop.eup %2465  ;;  %v1840_v26 = vadd.f32 1.0, %v2464_v42 }
 0x2e9   : > { %v2016_v16 = vsel %vm2015_vm11, %v2462_v12, %v2012_v45  ;;  %v2024_v47 = vmul.f32 %v2466_v60, %v1839_v46  ;;  %2467 = vpow2.f32 %v2263_v8  ;;  %vm2029_vm14 = vweird.f32 %v2466_v60 }
 0x2ea   : > { %v2021_v63 = vsel %vm2018_vm12, %v2020_v62, %v2016_v16  ;;  %2469 = vrcp.f32 %v1840_v26  ;;  %vm2030_vm0 = vmor %vm2028_vm15, %vm2029_vm14  ;;  %v2049_v33 = vand.u32 2147483648, %v1840_v26  ;;  %v2047_v5 = vand.u32 2147483647, %v1840_v26 }
 0x2eb   : > { %2095 = vst.msk [vmem:[%s2988_s11 + $0x58] sm:$0xff] %vm2083_vm13, %v2021_v63  ;;  %v2025_v49 = vsub.f32 1.0, %v2024_v47  ;;  %vm2043_vm3 = vweird.f32 %v1840_v26 }
 0x2ec   : > { %v1776_v61 = vpop.f32.mrf.mxu0  ;;  %v2050_v37 = vor.u32 1.1754944e-38, %v2049_v33  ;;  %vm2048_vm6 = vcmp.eq.f32.partialorder %v2047_v5, 8.507059e+37 }
 0x2ed   : > { %v2026_v20 = vmul.f32 %v2466_v60, %v2025_v49  ;;  %v1777_v27 = vadd.f32 %v2978_v14, %v1776_v61 }
 0x2ef   : > { %v2468_v57 = vpop.eup %2467  ;;  %v2027_v19 = vadd.f32 %v2466_v60, %v2026_v20  ;;  %v2264_v43 = vmul.f32 -1.442695, %v1777_v27 }
 0x2f0   : > { %v2470_v36 = vpop.eup %2469  ;;  %v1841_v31 = vadd.f32 1.0, %v2468_v57 }
 0x2f1   : > { %v2031_v21 = vsel %vm2030_vm0, %v2466_v60, %v2027_v19  ;;  %v2039_v17 = vmul.f32 %v2470_v36, %v1840_v26  ;;  %2471 = vpow2.f32 %v2264_v43  ;;  %vm2044_vm2 = vweird.f32 %v2470_v36 }
 0x2f2   : > { %v2036_v9 = vsel %vm2033_vm1, %v2035_v41, %v2031_v21  ;;  %2473 = vrcp.f32 %v1841_v31  ;;  %vm2045_vm4 = vmor %vm2043_vm3, %vm2044_vm2  ;;  %v2064_v15 = vand.u32 2147483648, %v1841_v31  ;;  %v2062_v7 = vand.u32 2147483647, %v1841_v31 }
 0x2f3   : > { %2096 = vst.msk [vmem:[%s2988_s11 + $0x60] sm:$0xff] %vm2083_vm13, %v2036_v9  ;;  %v2040_v38 = vsub.f32 1.0, %v2039_v17  ;;  %vm2058_vm8 = vweird.f32 %v1841_v31 }
 0x2f4   : > { %v2065_v28 = vor.u32 1.1754944e-38, %v2064_v15  ;;  %vm2063_vm10 = vcmp.eq.f32.partialorder %v2062_v7, 8.507059e+37 }
 0x2f5   : > { %v2041_v14 = vmul.f32 %v2470_v36, %v2040_v38 }
 0x2f7   : > { %v2472_v13 = vpop.eup %2471  ;;  %v2042_v6 = vadd.f32 %v2470_v36, %v2041_v14 }
 0x2f8   : > { %v2474_v23 = vpop.eup %2473  ;;  %v1842_v11 = vadd.f32 1.0, %v2472_v13 }
 0x2f9   : > { %v2046_v22 = vsel %vm2045_vm4, %v2470_v36, %v2042_v6  ;;  %v2054_v39 = vmul.f32 %v2474_v23, %v1841_v31  ;;  %vm2059_vm7 = vweird.f32 %v2474_v23 }
 0x2fa   : > { %v2051_v0 = vsel %vm2048_vm6, %v2050_v37, %v2046_v22  ;;  %2475 = vrcp.f32 %v1842_v11  ;;  %vm2060_vm9 = vmor %vm2058_vm8, %vm2059_vm7  ;;  %v2079_v51 = vand.u32 2147483648, %v1842_v11  ;;  %v2077_v34 = vand.u32 2147483647, %v1842_v11 }
 0x2fb   : > { %2097 = vst.msk [vmem:[%s2988_s11 + $0x68] sm:$0xff] %vm2083_vm13, %v2051_v0  ;;  %v2055_v48 = vsub.f32 1.0, %v2054_v39  ;;  %vm2073_vm11 = vweird.f32 %v1842_v11 }
 0x2fc   : > { %v2080_v58 = vor.u32 1.1754944e-38, %v2079_v51  ;;  %vm2078_vm14 = vcmp.eq.f32.partialorder %v2077_v34, 8.507059e+37 }
 0x2fd   : > { %v2056_v52 = vmul.f32 %v2474_v23, %v2055_v48 }
 0x2ff   : > { %v2057_v3 = vadd.f32 %v2474_v23, %v2056_v52 }
 0x300   : > { %v2476_v32 = vpop.eup %2475 }
 0x301   : > { %v2061_v50 = vsel %vm2060_vm9, %v2474_v23, %v2057_v3  ;;  %v2069_v54 = vmul.f32 %v2476_v32, %v1842_v11  ;;  %vm2074_vm5 = vweird.f32 %v2476_v32 }
 0x302   : > { %v2066_v55 = vsel %vm2063_vm10, %v2065_v28, %v2061_v50  ;;  %vm2075_vm12 = vmor %vm2073_vm11, %vm2074_vm5 }
 0x303   : > { %2098 = vst.msk [vmem:[%s2988_s11 + $0x70] sm:$0xff] %vm2083_vm13, %v2066_v55  ;;  %v2070_v24 = vsub.f32 1.0, %v2069_v54 }
 0x305   : > { %v2071_v56 = vmul.f32 %v2476_v32, %v2070_v24 }
 0x307   : > { %v2072_v35 = vadd.f32 %v2476_v32, %v2071_v56 }
 0x309   : > { %v2076_v12 = vsel %vm2075_vm12, %v2476_v32, %v2072_v35 }
 0x30a   : > { %v2081_v30 = vsel %vm2078_vm14, %v2080_v58, %v2076_v12 }
 0x30b   : > { %2099 = vst.msk [vmem:[%s2988_s11 + $0x78] sm:$0xff] %vm2083_vm13, %v2081_v30 }
 0x30c PF: > { %s17_s24 = sadd.s32 1, %s2483_s24  }
 0x30d   : > { %p14_p4 = scmp.ge.s32.totalorder %s17_s24, 4  }
 0x30f   :  { %16 = sbr.rel (!%p14_p4) target bundleno = 1 (0x1), region = 78 }

</bundles_post_ra>
